<compile_context>
chip_gen: v6e
topology: v6e:2x2x1
jax: 0.10.0
libtpu: 0.0.40
codegen_flags: <defaults>
</compile_context>

<pallas_src>
import functools
import math

import jax
import jax.numpy as jnp
from jax.experimental import pallas as pl
from jax.experimental.pallas import tpu as pltpu


# ----------------------------------------------------------------------------- helpers
def _tile(dim, target):
    """Largest 'nice' tile <= target that divides dim; falls back to full dim."""
    for t in (target, 512, 256, 128):
        if t <= dim and dim % t == 0:
            return t
    return dim


def _apply_act(y, activation):
    if activation == "none":
        return y
    if activation == "gelu":
        # TODO(synk): HF RoBERTa uses erf-GELU; tanh-approx GELU used here (EUP friendly).
        return jax.nn.gelu(y, approximate=True)
    raise ValueError(activation)


# ----------------------------------------------------------------------------- tiled linear
def _linear_kernel(x_ref, w_ref, b_ref, o_ref, acc_ref, *, activation):
    @pl.when(pl.program_id(2) == 0)
    def _init():
        acc_ref[...] = jnp.zeros_like(acc_ref)

    acc_ref[...] += jnp.dot(x_ref[...], w_ref[...],
                            preferred_element_type=jnp.float32)

    @pl.when(pl.program_id(2) == pl.num_programs(2) - 1)
    def _finalize():
        y = acc_ref[...] + b_ref[...]
        o_ref[...] = _apply_act(y, activation).astype(o_ref.dtype)


def linear(x, w, b, activation="none", out_dtype=jnp.bfloat16):
    """y = act(x @ w + b), x:(M,K) w:(K,N) -> (M,N).  bf16 MXU inputs, f32 accum."""
    M, K = x.shape
    N = w.shape[1]
    tm, tn, tk = _tile(M, 256), _tile(N, 256), _tile(K, 512)
    grid = (M // tm, N // tn, K // tk)
    return pl.pallas_call(
        functools.partial(_linear_kernel, activation=activation),
        out_shape=jax.ShapeDtypeStruct((M, N), out_dtype),
        grid=grid,
        in_specs=[
            pl.BlockSpec((tm, tk), lambda i, j, k: (i, k)),
            pl.BlockSpec((tk, tn), lambda i, j, k: (k, j)),
            pl.BlockSpec((1, tn), lambda i, j, k: (0, j)),
        ],
        out_specs=pl.BlockSpec((tm, tn), lambda i, j, k: (i, j)),
        scratch_shapes=[pltpu.VMEM((tm, tn), jnp.float32)],
        compiler_params=pltpu.CompilerParams(
            dimension_semantics=("parallel", "parallel", "arbitrary")),
    )(x.astype(jnp.bfloat16), w.astype(jnp.bfloat16),
      b.reshape(1, N).astype(jnp.float32))


# ----------------------------------------------------------------------------- layernorm (row-tiled, optional fused residual)
def _ln_math(x, g, b, eps):
    mu = jnp.mean(x, axis=-1, keepdims=True)
    xc = x - mu
    var = jnp.mean(xc * xc, axis=-1, keepdims=True)
    return xc * jax.lax.rsqrt(var + eps) * g + b


def _ln_kernel(x_ref, g_ref, b_ref, o_ref, *, eps):
    x = x_ref[...].astype(jnp.float32)
    o_ref[...] = _ln_math(x, g_ref[...], b_ref[...], eps).astype(o_ref.dtype)


def _ln_res_kernel(x_ref, r_ref, g_ref, b_ref, o_ref, *, eps):
    x = x_ref[...].astype(jnp.float32) + r_ref[...].astype(jnp.float32)
    o_ref[...] = _ln_math(x, g_ref[...], b_ref[...], eps).astype(o_ref.dtype)


def layernorm(x, gamma, beta, eps=1e-5, out_dtype=jnp.bfloat16):
    M, H = x.shape
    tm = _tile(M, 512)
    return pl.pallas_call(
        functools.partial(_ln_kernel, eps=eps),
        out_shape=jax.ShapeDtypeStruct((M, H), out_dtype),
        grid=(M // tm,),
        in_specs=[
            pl.BlockSpec((tm, H), lambda i: (i, 0)),
            pl.BlockSpec((1, H), lambda i: (0, 0)),
            pl.BlockSpec((1, H), lambda i: (0, 0)),
        ],
        out_specs=pl.BlockSpec((tm, H), lambda i: (i, 0)),
        compiler_params=pltpu.CompilerParams(dimension_semantics=("parallel",)),
    )(x, gamma.reshape(1, H).astype(jnp.float32),
      beta.reshape(1, H).astype(jnp.float32))


def layernorm_residual(x, res, gamma, beta, eps=1e-5, out_dtype=jnp.bfloat16):
    M, H = x.shape
    tm = _tile(M, 512)
    return pl.pallas_call(
        functools.partial(_ln_res_kernel, eps=eps),
        out_shape=jax.ShapeDtypeStruct((M, H), out_dtype),
        grid=(M // tm,),
        in_specs=[
            pl.BlockSpec((tm, H), lambda i: (i, 0)),
            pl.BlockSpec((tm, H), lambda i: (i, 0)),
            pl.BlockSpec((1, H), lambda i: (0, 0)),
            pl.BlockSpec((1, H), lambda i: (0, 0)),
        ],
        out_specs=pl.BlockSpec((tm, H), lambda i: (i, 0)),
        compiler_params=pltpu.CompilerParams(dimension_semantics=("parallel",)),
    )(x, res, gamma.reshape(1, H).astype(jnp.float32),
      beta.reshape(1, H).astype(jnp.float32))


# ----------------------------------------------------------------------------- attention (consumes fused QKV directly)
def _attn_compute(q_ref, kv_ref, bias_ref, *, scale, n_heads, dh, hidden,
                  collect_row):
    """Per-head attention on a (tq, H) query tile vs full (S, H) keys/values.

    q_ref : (1, tq, 3H) bf16 view of the fused QKV projection (query rows)
    kv_ref: (1, S,  3H) bf16 view of the same tensor (all rows; resident)
    """
    q_full = q_ref[0]                               # (tq, 3H) bf16
    kv_full = kv_ref[0]                             # (S,  3H) bf16
    bias = bias_ref[0].astype(jnp.float32)          # (1, S)

    # Fold 1/sqrt(dh) into Q once per tile (instead of scaling every (tq,S) score tile).
    q_scaled = (q_full[:, 0:hidden].astype(jnp.float32) * scale).astype(jnp.bfloat16)

    ctx_parts = []
    row_acc = None
    for h in range(n_heads):                        # static unroll over heads
        lo, hi = h * dh, (h + 1) * dh
        q = q_scaled[:, lo:hi]                      # (tq, dh)
        k = kv_full[:, hidden + lo:hidden + hi]     # (S, dh)
        v = kv_full[:, 2 * hidden + lo:2 * hidden + hi]
        s = jax.lax.dot_general(q, k, (((1,), (1,)), ((), ())),
                                preferred_element_type=jnp.float32)
        s = s + bias                                # (tq, S) f32
        m = jnp.max(s, axis=-1, keepdims=True)
        e = jnp.exp(s - m)
        denom = jnp.sum(e, axis=-1, keepdims=True)
        p = e * pl.reciprocal(denom, approx=True)   # EUP vrcp slot
        ctx_parts.append(jnp.dot(p.astype(v.dtype), v,
                                 preferred_element_type=jnp.float32))
        if collect_row:
            r = p[0:1, :]                           # CLS query row (meaningful when qi == 0)
            row_acc = r if row_acc is None else row_acc + r
    ctx = jnp.concatenate(ctx_parts, axis=-1)       # (tq, H), lane-dense
    return ctx, row_acc


def _attn_kernel(q_ref, kv_ref, bias_ref, ctx_ref, *, scale, n_heads, dh, hidden):
    ctx, _ = _attn_compute(q_ref, kv_ref, bias_ref, scale=scale, n_heads=n_heads,
                           dh=dh, hidden=hidden, collect_row=False)
    ctx_ref[0] = ctx.astype(ctx_ref.dtype)


def _attn_collect_kernel(q_ref, kv_ref, bias_ref, ctx_ref, arow_ref,
                         *, scale, n_heads, dh, hidden):
    ctx, row = _attn_compute(q_ref, kv_ref, bias_ref, scale=scale, n_heads=n_heads,
                             dh=dh, hidden=hidden, collect_row=True)
    ctx_ref[0] = ctx.astype(ctx_ref.dtype)

    @pl.when(pl.program_id(1) == 0)                 # CLS row lives in the first query tile
    def _():
        arow_ref[0] = row.astype(arow_ref.dtype)


def fused_attention(qkv, bias, *, n_heads, collect_row):
    """qkv: (B, S, 3H) bf16 fused projection [Q | K | V]; bias: (B, 1, S) f32 mask.
    Returns ctx (B,S,H) bf16 and, if collect_row, the head-summed CLS probs (B,1,S)."""
    B, S, H3 = qkv.shape
    H = H3 // 3
    dh = H // n_heads
    tq = _tile(S, 256)
    scale = 1.0 / math.sqrt(dh)                     # python float -> not a captured tracer
    grid = (B, S // tq)

    q_spec = pl.BlockSpec((1, tq, H3), lambda b, qi: (b, qi, 0))
    # index constant along qi -> KV block DMA'd once per batch elem, stays resident in VMEM
    kv_spec = pl.BlockSpec((1, S, H3), lambda b, qi: (b, 0, 0))
    bias_spec = pl.BlockSpec((1, 1, S), lambda b, qi: (b, 0, 0))
    ctx_spec = pl.BlockSpec((1, tq, H), lambda b, qi: (b, qi, 0))
    cp = pltpu.CompilerParams(dimension_semantics=("parallel", "arbitrary"))
    kw = dict(scale=scale, n_heads=n_heads, dh=dh, hidden=H)

    if collect_row:
        return pl.pallas_call(
            functools.partial(_attn_collect_kernel, **kw),
            out_shape=(jax.ShapeDtypeStruct((B, S, H), jnp.bfloat16),
                       jax.ShapeDtypeStruct((B, 1, S), jnp.float32)),
            grid=grid,
            in_specs=[q_spec, kv_spec, bias_spec],
            out_specs=(ctx_spec, pl.BlockSpec((1, 1, S), lambda b, qi: (b, 0, 0))),
            compiler_params=cp,
        )(qkv, qkv, bias)

    return pl.pallas_call(
        functools.partial(_attn_kernel, **kw),
        out_shape=jax.ShapeDtypeStruct((B, S, H), jnp.bfloat16),
        grid=grid,
        in_specs=[q_spec, kv_spec, bias_spec],
        out_specs=ctx_spec,
        compiler_params=cp,
    )(qkv, qkv, bias)


# ----------------------------------------------------------------------------- pooler + fc head (fused, tiny)
def _pooler_head_kernel(cls_ref, pw_ref, pb_ref, fw_ref, fb_ref, o_ref):
    y = jnp.dot(cls_ref[...], pw_ref[...],
                preferred_element_type=jnp.float32) + pb_ref[...]
    y = jnp.maximum(jnp.tanh(y), 0.0)               # pooler tanh, then model-level ReLU
    h = jnp.dot(y.astype(fw_ref.dtype), fw_ref[...],
                preferred_element_type=jnp.float32) + fb_ref[...]
    o_ref[...] = h.astype(o_ref.dtype)


def pooler_head(cls, pw, pb, fw, fb):
    B, H = cls.shape
    return pl.pallas_call(
        _pooler_head_kernel,
        out_shape=jax.ShapeDtypeStruct((B, 1), jnp.float32),
        grid=(1,),
        in_specs=[
            pl.BlockSpec((B, H), lambda i: (0, 0)),
            pl.BlockSpec((H, H), lambda i: (0, 0)),
            pl.BlockSpec((1, H), lambda i: (0, 0)),
            pl.BlockSpec((H, 1), lambda i: (0, 0)),
            pl.BlockSpec((1, 1), lambda i: (0, 0)),
        ],
        out_specs=pl.BlockSpec((B, 1), lambda i: (0, 0)),
    )(cls.astype(jnp.bfloat16), pw.astype(jnp.bfloat16),
      pb.reshape(1, H).astype(jnp.float32),
      fw.astype(jnp.bfloat16), fb.reshape(1, 1).astype(jnp.float32))


# ----------------------------------------------------------------------------- model
def init_params(key, vocab, hidden, n_layers, n_heads, ffn, max_pos):
    def norm(k, shape):
        return 0.02 * jax.random.normal(k, shape, jnp.float32)

    keys = iter(jax.random.split(key, 5 + 4 * n_layers))
    p = {
        "word_emb": norm(next(keys), (vocab, hidden)),
        "pos_emb": norm(next(keys), (max_pos, hidden)),
        "type_emb": norm(next(keys), (1, hidden)),
        "emb_ln_g": jnp.ones((hidden,), jnp.float32),
        "emb_ln_b": jnp.zeros((hidden,), jnp.float32),
        "pool_w": norm(next(keys), (hidden, hidden)),
        "pool_b": jnp.zeros((hidden,), jnp.float32),
        "fc_w": norm(next(keys), (hidden, 1)),
        "fc_b": jnp.zeros((1,), jnp.float32),
        "layers": [],
    }
    for _ in range(n_layers):
        p["layers"].append({
            "w_qkv": norm(next(keys), (hidden, 3 * hidden)),   # fused Q/K/V projection
            "b_qkv": jnp.zeros((3 * hidden,), jnp.float32),
            "wo": norm(next(keys), (hidden, hidden)),
            "bo": jnp.zeros((hidden,), jnp.float32),
            "ln1_g": jnp.ones((hidden,), jnp.float32),
            "ln1_b": jnp.zeros((hidden,), jnp.float32),
            "w1": norm(next(keys), (hidden, ffn)),
            "b1": jnp.zeros((ffn,), jnp.float32),
            "w2": norm(next(keys), (ffn, hidden)),
            "b2": jnp.zeros((hidden,), jnp.float32),
            "ln2_g": jnp.ones((hidden,), jnp.float32),
            "ln2_b": jnp.zeros((hidden,), jnp.float32),
        })
    return p


def codebert_forward(params, ids, mask, *, n_heads):
    B, S = ids.shape
    H = params["word_emb"].shape[1]
    pad_idx = 1

    # ---- RoBERTa embeddings (gathers / cumsum are plain-JAX glue; LN is Pallas)
    # TODO(synk): embedding row-gather left to XLA; a DMA-gather kernel is possible but not needed here.
    not_pad = (ids != pad_idx).astype(jnp.int32)
    pos_ids = jnp.cumsum(not_pad, axis=1) * not_pad + pad_idx
    emb = (params["word_emb"][ids]
           + params["pos_emb"][pos_ids]
           + params["type_emb"][0][None, None, :])
    x = layernorm(emb.reshape(B * S, H), params["emb_ln_g"], params["emb_ln_b"])

    # additive attention-mask bias, kept un-broadcast at (B, 1, S) in f32
    mask_bias = ((1.0 - mask.astype(jnp.float32)) * -1e9).reshape(B, 1, S)

    a_row = None
    n_layers = len(params["layers"])
    for li, layer in enumerate(params["layers"]):
        last = li == n_layers - 1
        xf = x                                                    # (B*S, H) bf16
        qkv = linear(xf, layer["w_qkv"], layer["b_qkv"])          # one MXU pass -> (B*S, 3H)
        qkv3 = qkv.reshape(B, S, 3 * H)                           # free reshape, no split copies

        if last:
            # only the last layer produces the head-summed CLS attention row
            ctx, a_row = fused_attention(qkv3, mask_bias,
                                         n_heads=n_heads, collect_row=True)
        else:
            ctx = fused_attention(qkv3, mask_bias,
                                  n_heads=n_heads, collect_row=False)

        attn_out = linear(ctx.reshape(B * S, H), layer["wo"], layer["bo"])
        x1 = layernorm_residual(attn_out, xf, layer["ln1_g"], layer["ln1_b"])
        ff = linear(x1, layer["w1"], layer["b1"], activation="gelu")
        ff = linear(ff, layer["w2"], layer["b2"])
        x = layernorm_residual(ff, x1, layer["ln2_g"], layer["ln2_b"])

    # ---- pooler (dense + tanh on [CLS]) -> ReLU -> fc head, fused in one kernel
    cls = x.reshape(B, S, H)[:, 0, :]                             # (B, H)
    h = pooler_head(cls, params["pool_w"], params["pool_b"],
                    params["fc_w"], params["fc_b"])               # (B, 1)

    a = a_row.reshape(B, S)                                       # attentions[-1].sum(1)[:, 0, :]
    return h, a


# ----------------------------------------------------------------------------- main
if __name__ == "__main__":
    B, S = 2, 8
    VOCAB, HIDDEN, N_HEADS, N_LAYERS, FFN, MAX_POS = 100, 32, 4, 2, 64, 16

    root = jax.random.PRNGKey(0)
    k_param, k_ids = jax.random.split(root)
    params = init_params(k_param, VOCAB, HIDDEN, N_LAYERS, N_HEADS, FFN, MAX_POS)

    ids = jax.random.randint(k_ids, (B, S), 3, VOCAB, dtype=jnp.int32)
    ids = ids.at[1, 6:].set(1)                      # pad token (RoBERTa pad_idx = 1)
    mask = jnp.ones((B, S), jnp.int32).at[1, 6:].set(0)

    fwd = jax.jit(functools.partial(codebert_forward, n_heads=N_HEADS))
    h, a = fwd(params, ids, mask)
    jax.block_until_ready((h, a))
    assert h.shape == (B, 1) and a.shape == (B, S)
    assert bool(jnp.all(jnp.isfinite(h))) and bool(jnp.all(jnp.isfinite(a)))
    print("KERNEL_OK")
</pallas_src>

<mosaic_0001>
module attributes {stable_mosaic.version = 11 : i64} {
  func.func @_attn_kernel(%arg0: i32, %arg1: i32, %arg2: memref<1x8x96xbf16, #tpu.memory_space<vmem>>, %arg3: memref<1x8x96xbf16, #tpu.memory_space<vmem>>, %arg4: memref<1x1x8xf32, #tpu.memory_space<vmem>>, %arg5: memref<1x8x32xbf16, #tpu.memory_space<vmem>>) attributes {dimension_semantics = [#tpu.dimension_semantics<parallel>, #tpu.dimension_semantics<arbitrary>], iteration_bounds = array<i64: 2, 1>, scalar_prefetch = 0 : i64, scratch_operands = 0 : i64, tpu.core_type = #tpu.core_type<tc>, window_params = [{transform_indices = @transform_0, window_bounds = array<i64: 1, 8, 96>}, {transform_indices = @transform_1, window_bounds = array<i64: 1, 8, 96>}, {transform_indices = @transform_2, window_bounds = array<i64: 1, 1, 8>}, {transform_indices = @transform_3, window_bounds = array<i64: 1, 8, 32>}]} {
    %c0 = arith.constant 0 : index
    %c0_0 = arith.constant 0 : index
    %c0_1 = arith.constant 0 : index
    %0 = vector.load %arg2[%c0, %c0_0, %c0_1] : memref<1x8x96xbf16, #tpu.memory_space<vmem>>, vector<1x8x96xbf16>
    %1 = vector.shape_cast %0 : vector<1x8x96xbf16> to vector<8x96xbf16>
    %c0_2 = arith.constant 0 : index
    %c0_3 = arith.constant 0 : index
    %c0_4 = arith.constant 0 : index
    %2 = vector.load %arg3[%c0_2, %c0_3, %c0_4] : memref<1x8x96xbf16, #tpu.memory_space<vmem>>, vector<1x8x96xbf16>
    %3 = vector.shape_cast %2 : vector<1x8x96xbf16> to vector<8x96xbf16>
    %c0_5 = arith.constant 0 : index
    %c0_6 = arith.constant 0 : index
    %c0_7 = arith.constant 0 : index
    %4 = vector.load %arg4[%c0_5, %c0_6, %c0_7] : memref<1x1x8xf32, #tpu.memory_space<vmem>>, vector<1x1x8xf32>
    %5 = vector.shape_cast %4 : vector<1x1x8xf32> to vector<1x8xf32>
    %6 = vector.extract_strided_slice %1 {offsets = [0, 0], sizes = [8, 32], strides = [1, 1]} : vector<8x96xbf16> to vector<8x32xbf16>
    %7 = arith.extf %6 : vector<8x32xbf16> to vector<8x32xf32>
    %cst = arith.constant 0.353553385 : f32
    %8 = vector.broadcast %cst : f32 to vector<8x32xf32>
    %9 = arith.mulf %7, %8 : vector<8x32xf32>
    %10 = arith.truncf %9 : vector<8x32xf32> to vector<8x32xbf16>
    %11 = vector.extract_strided_slice %10 {offsets = [0, 0], sizes = [8, 8], strides = [1, 1]} : vector<8x32xbf16> to vector<8x8xbf16>
    %12 = vector.extract_strided_slice %3 {offsets = [0, 32], sizes = [8, 8], strides = [1, 1]} : vector<8x96xbf16> to vector<8x8xbf16>
    %13 = vector.extract_strided_slice %3 {offsets = [0, 64], sizes = [8, 8], strides = [1, 1]} : vector<8x96xbf16> to vector<8x8xbf16>
    %cst_8 = arith.constant dense<0.000000e+00> : vector<8x8xf32>
    %14 = tpu.matmul %11, %12, %cst_8 {dimension_numbers = #tpu.dot_dimension_numbers<[1], [1], [0], [0], [0, 0, 1, 0], [], []>} : vector<8x8xbf16>, vector<8x8xbf16>, vector<8x8xf32> -> vector<8x8xf32>
    %15 = vector.broadcast %5 : vector<1x8xf32> to vector<8x8xf32>
    %16 = arith.addf %14, %15 : vector<8x8xf32>
    %cst_9 = arith.constant dense<0xFF800000> : vector<8xf32>
    %17 = vector.multi_reduction <maximumf>, %16, %cst_9 [1] : vector<8x8xf32> to vector<8xf32>
    %18 = vector.shape_cast %17 : vector<8xf32> to vector<8x1xf32>
    %19 = vector.broadcast %18 : vector<8x1xf32> to vector<8x8xf32>
    %20 = arith.subf %16, %19 : vector<8x8xf32>
    %21 = math.exp %20 : vector<8x8xf32>
    %cst_10 = arith.constant dense<0.000000e+00> : vector<8xf32>
    %22 = vector.multi_reduction <add>, %21, %cst_10 [1] : vector<8x8xf32> to vector<8xf32>
    %23 = vector.shape_cast %22 : vector<8xf32> to vector<8x1xf32>
    %24 = tpu.reciprocal %23 {approx = true} : vector<8x1xf32> -> vector<8x1xf32>
    %25 = vector.broadcast %24 : vector<8x1xf32> to vector<8x8xf32>
    %26 = arith.mulf %21, %25 : vector<8x8xf32>
    %27 = arith.truncf %26 : vector<8x8xf32> to vector<8x8xbf16>
    %cst_11 = arith.constant dense<0.000000e+00> : vector<8x8xf32>
    %28 = tpu.matmul %27, %13, %cst_11 {dimension_numbers = #tpu.dot_dimension_numbers<[1], [0], [0], [1], [0, 0, 1, 1], [], []>} : vector<8x8xbf16>, vector<8x8xbf16>, vector<8x8xf32> -> vector<8x8xf32>
    %29 = vector.extract_strided_slice %10 {offsets = [0, 8], sizes = [8, 8], strides = [1, 1]} : vector<8x32xbf16> to vector<8x8xbf16>
    %30 = vector.extract_strided_slice %3 {offsets = [0, 40], sizes = [8, 8], strides = [1, 1]} : vector<8x96xbf16> to vector<8x8xbf16>
    %31 = vector.extract_strided_slice %3 {offsets = [0, 72], sizes = [8, 8], strides = [1, 1]} : vector<8x96xbf16> to vector<8x8xbf16>
    %cst_12 = arith.constant dense<0.000000e+00> : vector<8x8xf32>
    %32 = tpu.matmul %29, %30, %cst_12 {dimension_numbers = #tpu.dot_dimension_numbers<[1], [1], [0], [0], [0, 0, 1, 0], [], []>} : vector<8x8xbf16>, vector<8x8xbf16>, vector<8x8xf32> -> vector<8x8xf32>
    %33 = vector.broadcast %5 : vector<1x8xf32> to vector<8x8xf32>
    %34 = arith.addf %32, %33 : vector<8x8xf32>
    %cst_13 = arith.constant dense<0xFF800000> : vector<8xf32>
    %35 = vector.multi_reduction <maximumf>, %34, %cst_13 [1] : vector<8x8xf32> to vector<8xf32>
    %36 = vector.shape_cast %35 : vector<8xf32> to vector<8x1xf32>
    %37 = vector.broadcast %36 : vector<8x1xf32> to vector<8x8xf32>
    %38 = arith.subf %34, %37 : vector<8x8xf32>
    %39 = math.exp %38 : vector<8x8xf32>
    %cst_14 = arith.constant dense<0.000000e+00> : vector<8xf32>
    %40 = vector.multi_reduction <add>, %39, %cst_14 [1] : vector<8x8xf32> to vector<8xf32>
    %41 = vector.shape_cast %40 : vector<8xf32> to vector<8x1xf32>
    %42 = tpu.reciprocal %41 {approx = true} : vector<8x1xf32> -> vector<8x1xf32>
    %43 = vector.broadcast %42 : vector<8x1xf32> to vector<8x8xf32>
    %44 = arith.mulf %39, %43 : vector<8x8xf32>
    %45 = arith.truncf %44 : vector<8x8xf32> to vector<8x8xbf16>
    %cst_15 = arith.constant dense<0.000000e+00> : vector<8x8xf32>
    %46 = tpu.matmul %45, %31, %cst_15 {dimension_numbers = #tpu.dot_dimension_numbers<[1], [0], [0], [1], [0, 0, 1, 1], [], []>} : vector<8x8xbf16>, vector<8x8xbf16>, vector<8x8xf32> -> vector<8x8xf32>
    %47 = vector.extract_strided_slice %10 {offsets = [0, 16], sizes = [8, 8], strides = [1, 1]} : vector<8x32xbf16> to vector<8x8xbf16>
    %48 = vector.extract_strided_slice %3 {offsets = [0, 48], sizes = [8, 8], strides = [1, 1]} : vector<8x96xbf16> to vector<8x8xbf16>
    %49 = vector.extract_strided_slice %3 {offsets = [0, 80], sizes = [8, 8], strides = [1, 1]} : vector<8x96xbf16> to vector<8x8xbf16>
    %cst_16 = arith.constant dense<0.000000e+00> : vector<8x8xf32>
    %50 = tpu.matmul %47, %48, %cst_16 {dimension_numbers = #tpu.dot_dimension_numbers<[1], [1], [0], [0], [0, 0, 1, 0], [], []>} : vector<8x8xbf16>, vector<8x8xbf16>, vector<8x8xf32> -> vector<8x8xf32>
    %51 = vector.broadcast %5 : vector<1x8xf32> to vector<8x8xf32>
    %52 = arith.addf %50, %51 : vector<8x8xf32>
    %cst_17 = arith.constant dense<0xFF800000> : vector<8xf32>
    %53 = vector.multi_reduction <maximumf>, %52, %cst_17 [1] : vector<8x8xf32> to vector<8xf32>
    %54 = vector.shape_cast %53 : vector<8xf32> to vector<8x1xf32>
    %55 = vector.broadcast %54 : vector<8x1xf32> to vector<8x8xf32>
    %56 = arith.subf %52, %55 : vector<8x8xf32>
    %57 = math.exp %56 : vector<8x8xf32>
    %cst_18 = arith.constant dense<0.000000e+00> : vector<8xf32>
    %58 = vector.multi_reduction <add>, %57, %cst_18 [1] : vector<8x8xf32> to vector<8xf32>
    %59 = vector.shape_cast %58 : vector<8xf32> to vector<8x1xf32>
    %60 = tpu.reciprocal %59 {approx = true} : vector<8x1xf32> -> vector<8x1xf32>
    %61 = vector.broadcast %60 : vector<8x1xf32> to vector<8x8xf32>
    %62 = arith.mulf %57, %61 : vector<8x8xf32>
    %63 = arith.truncf %62 : vector<8x8xf32> to vector<8x8xbf16>
    %cst_19 = arith.constant dense<0.000000e+00> : vector<8x8xf32>
    %64 = tpu.matmul %63, %49, %cst_19 {dimension_numbers = #tpu.dot_dimension_numbers<[1], [0], [0], [1], [0, 0, 1, 1], [], []>} : vector<8x8xbf16>, vector<8x8xbf16>, vector<8x8xf32> -> vector<8x8xf32>
    %65 = vector.extract_strided_slice %10 {offsets = [0, 24], sizes = [8, 8], strides = [1, 1]} : vector<8x32xbf16> to vector<8x8xbf16>
    %66 = vector.extract_strided_slice %3 {offsets = [0, 56], sizes = [8, 8], strides = [1, 1]} : vector<8x96xbf16> to vector<8x8xbf16>
    %67 = vector.extract_strided_slice %3 {offsets = [0, 88], sizes = [8, 8], strides = [1, 1]} : vector<8x96xbf16> to vector<8x8xbf16>
    %cst_20 = arith.constant dense<0.000000e+00> : vector<8x8xf32>
    %68 = tpu.matmul %65, %66, %cst_20 {dimension_numbers = #tpu.dot_dimension_numbers<[1], [1], [0], [0], [0, 0, 1, 0], [], []>} : vector<8x8xbf16>, vector<8x8xbf16>, vector<8x8xf32> -> vector<8x8xf32>
    %69 = vector.broadcast %5 : vector<1x8xf32> to vector<8x8xf32>
    %70 = arith.addf %68, %69 : vector<8x8xf32>
    %cst_21 = arith.constant dense<0xFF800000> : vector<8xf32>
    %71 = vector.multi_reduction <maximumf>, %70, %cst_21 [1] : vector<8x8xf32> to vector<8xf32>
    %72 = vector.shape_cast %71 : vector<8xf32> to vector<8x1xf32>
    %73 = vector.broadcast %72 : vector<8x1xf32> to vector<8x8xf32>
    %74 = arith.subf %70, %73 : vector<8x8xf32>
    %75 = math.exp %74 : vector<8x8xf32>
    %cst_22 = arith.constant dense<0.000000e+00> : vector<8xf32>
    %76 = vector.multi_reduction <add>, %75, %cst_22 [1] : vector<8x8xf32> to vector<8xf32>
    %77 = vector.shape_cast %76 : vector<8xf32> to vector<8x1xf32>
    %78 = tpu.reciprocal %77 {approx = true} : vector<8x1xf32> -> vector<8x1xf32>
    %79 = vector.broadcast %78 : vector<8x1xf32> to vector<8x8xf32>
    %80 = arith.mulf %75, %79 : vector<8x8xf32>
    %81 = arith.truncf %80 : vector<8x8xf32> to vector<8x8xbf16>
    %cst_23 = arith.constant dense<0.000000e+00> : vector<8x8xf32>
    %82 = tpu.matmul %81, %67, %cst_23 {dimension_numbers = #tpu.dot_dimension_numbers<[1], [0], [0], [1], [0, 0, 1, 1], [], []>} : vector<8x8xbf16>, vector<8x8xbf16>, vector<8x8xf32> -> vector<8x8xf32>
    %83 = tpu.concatenate %28, %46, %64, %82 in 1 : vector<8x8xf32>, vector<8x8xf32>, vector<8x8xf32>, vector<8x8xf32> -> vector<8x32xf32>
    %84 = arith.truncf %83 : vector<8x32xf32> to vector<8x32xbf16>
    %c0_24 = arith.constant 0 : index
    %c0_25 = arith.constant 0 : index
    %c0_26 = arith.constant 0 : index
    %85 = vector.load %arg5[%c0_24, %c0_25, %c0_26] : memref<1x8x32xbf16, #tpu.memory_space<vmem>>, vector<1x8x32xbf16>
    %86 = vector.shape_cast %85 : vector<1x8x32xbf16> to vector<8x32xbf16>
    %87 = vector.shape_cast %84 : vector<8x32xbf16> to vector<1x8x32xbf16>
    tpu.vector_store %arg5[%c0_24, %c0_25, %c0_26], %87 {strides = array<i32>} : memref<1x8x32xbf16, #tpu.memory_space<vmem>>, vector<1x8x32xbf16>,
    return
  }
  func.func @transform_0(%arg0: i32, %arg1: i32) -> (i32, i32, i32) {
    %c0_i32 = arith.constant 0 : i32
    %c0_i32_0 = arith.constant 0 : i32
    return %arg0, %arg1, %c0_i32 : i32, i32, i32
  }
  func.func @transform_1(%arg0: i32, %arg1: i32) -> (i32, i32, i32) {
    %c0_i32 = arith.constant 0 : i32
    %c0_i32_0 = arith.constant 0 : i32
    %c0_i32_1 = arith.constant 0 : i32
    return %arg0, %c0_i32, %c0_i32_0 : i32, i32, i32
  }
  func.func @transform_2(%arg0: i32, %arg1: i32) -> (i32, i32, i32) {
    %c0_i32 = arith.constant 0 : i32
    %c0_i32_0 = arith.constant 0 : i32
    %c0_i32_1 = arith.constant 0 : i32
    return %arg0, %c0_i32, %c0_i32_0 : i32, i32, i32
  }
  func.func @transform_3(%arg0: i32, %arg1: i32) -> (i32, i32, i32) {
    %c0_i32 = arith.constant 0 : i32
    %c0_i32_0 = arith.constant 0 : i32
    return %arg0, %arg1, %c0_i32 : i32, i32, i32
  }
}

module attributes {stable_mosaic.version = 11 : i64} {
  func.func @_linear_kernel(%arg0: i32, %arg1: i32, %arg2: i32, %arg3: memref<16x32xbf16, #tpu.memory_space<vmem>>, %arg4: memref<32x96xbf16, #tpu.memory_space<vmem>>, %arg5: memref<1x96xf32, #tpu.memory_space<vmem>>, %arg6: memref<16x96xbf16, #tpu.memory_space<vmem>>, %arg7: memref<16x96xf32, #tpu.memory_space<vmem>>) attributes {dimension_semantics = [#tpu.dimension_semantics<parallel>, #tpu.dimension_semantics<parallel>, #tpu.dimension_semantics<arbitrary>], iteration_bounds = array<i64: 1, 1, 1>, scalar_prefetch = 0 : i64, scratch_operands = 1 : i64, tpu.core_type = #tpu.core_type<tc>, window_params = [{transform_indices = @transform_0, window_bounds = array<i64: 16, 32>}, {transform_indices = @transform_1, window_bounds = array<i64: 32, 96>}, {transform_indices = @transform_2, window_bounds = array<i64: 1, 96>}, {transform_indices = @transform_3, window_bounds = array<i64: 16, 96>}]} {
    %c0_i32 = arith.constant 0 : i32
    %0 = arith.cmpi eq, %arg2, %c0_i32 : i32
    %1 = arith.extui %0 : i1 to i32
    %c0_i32_0 = arith.constant 0 : i32
    %2 = arith.cmpi ne, %1, %c0_i32_0 : i32
    scf.if %2 {
      %cst_10 = arith.constant 0.000000e+00 : f32
      %12 = vector.broadcast %cst_10 : f32 to vector<16x96xf32>
      %c0_11 = arith.constant 0 : index
      %c0_12 = arith.constant 0 : index
      %13 = vector.load %arg7[%c0_11, %c0_12] : memref<16x96xf32, #tpu.memory_space<vmem>>, vector<16x96xf32>
      tpu.vector_store %arg7[%c0_11, %c0_12], %12 {strides = array<i32>} : memref<16x96xf32, #tpu.memory_space<vmem>>, vector<16x96xf32>,
    } else {
    }
    %c0 = arith.constant 0 : index
    %c0_1 = arith.constant 0 : index
    %3 = vector.load %arg7[%c0, %c0_1] : memref<16x96xf32, #tpu.memory_space<vmem>>, vector<16x96xf32>
    %c0_2 = arith.constant 0 : index
    %c0_3 = arith.constant 0 : index
    %4 = vector.load %arg3[%c0_2, %c0_3] : memref<16x32xbf16, #tpu.memory_space<vmem>>, vector<16x32xbf16>
    %c0_4 = arith.constant 0 : index
    %c0_5 = arith.constant 0 : index
    %5 = vector.load %arg4[%c0_4, %c0_5] : memref<32x96xbf16, #tpu.memory_space<vmem>>, vector<32x96xbf16>
    %cst = arith.constant dense<0.000000e+00> : vector<16x96xf32>
    %6 = tpu.matmul %4, %5, %cst {dimension_numbers = #tpu.dot_dimension_numbers<[1], [0], [0], [1], [0, 0, 1, 1], [], []>} : vector<16x32xbf16>, vector<32x96xbf16>, vector<16x96xf32> -> vector<16x96xf32>
    %7 = arith.addf %3, %6 : vector<16x96xf32>
    %c0_6 = arith.constant 0 : index
    %c0_7 = arith.constant 0 : index
    %8 = vector.load %arg7[%c0_6, %c0_7] : memref<16x96xf32, #tpu.memory_space<vmem>>, vector<16x96xf32>
    tpu.vector_store %arg7[%c0_6, %c0_7], %7 {strides = array<i32>} : memref<16x96xf32, #tpu.memory_space<vmem>>, vector<16x96xf32>,
    %c0_i32_8 = arith.constant 0 : i32
    %9 = arith.cmpi eq, %arg2, %c0_i32_8 : i32
    %10 = arith.extui %9 : i1 to i32
    %c0_i32_9 = arith.constant 0 : i32
    %11 = arith.cmpi ne, %10, %c0_i32_9 : i32
    scf.if %11 {
      %c0_10 = arith.constant 0 : index
      %c0_11 = arith.constant 0 : index
      %12 = vector.load %arg7[%c0_10, %c0_11] : memref<16x96xf32, #tpu.memory_space<vmem>>, vector<16x96xf32>
      %c0_12 = arith.constant 0 : index
      %c0_13 = arith.constant 0 : index
      %13 = vector.load %arg5[%c0_12, %c0_13] : memref<1x96xf32, #tpu.memory_space<vmem>>, vector<1x96xf32>
      %14 = vector.broadcast %13 : vector<1x96xf32> to vector<16x96xf32>
      %15 = arith.addf %12, %14 : vector<16x96xf32>
      %16 = arith.truncf %15 : vector<16x96xf32> to vector<16x96xbf16>
      %c0_14 = arith.constant 0 : index
      %c0_15 = arith.constant 0 : index
      %17 = vector.load %arg6[%c0_14, %c0_15] : memref<16x96xbf16, #tpu.memory_space<vmem>>, vector<16x96xbf16>
      tpu.vector_store %arg6[%c0_14, %c0_15], %16 {strides = array<i32>} : memref<16x96xbf16, #tpu.memory_space<vmem>>, vector<16x96xbf16>,
    } else {
    }
    return
  }
  func.func @transform_0(%arg0: i32, %arg1: i32, %arg2: i32) -> (i32, i32) {
    %c0_i32 = arith.constant 0 : i32
    return %arg0, %arg2 : i32, i32
  }
  func.func @transform_1(%arg0: i32, %arg1: i32, %arg2: i32) -> (i32, i32) {
    %c0_i32 = arith.constant 0 : i32
    return %arg2, %arg1 : i32, i32
  }
  func.func @transform_2(%arg0: i32, %arg1: i32, %arg2: i32) -> (i32, i32) {
    %c0_i32 = arith.constant 0 : i32
    %c0_i32_0 = arith.constant 0 : i32
    return %c0_i32, %arg1 : i32, i32
  }
  func.func @transform_3(%arg0: i32, %arg1: i32, %arg2: i32) -> (i32, i32) {
    %c0_i32 = arith.constant 0 : i32
    return %arg0, %arg1 : i32, i32
  }
}

module attributes {stable_mosaic.version = 11 : i64} {
  func.func @_ln_kernel(%arg0: i32, %arg1: memref<16x32xf32, #tpu.memory_space<vmem>>, %arg2: memref<1x32xf32, #tpu.memory_space<vmem>>, %arg3: memref<1x32xf32, #tpu.memory_space<vmem>>, %arg4: memref<16x32xbf16, #tpu.memory_space<vmem>>) attributes {dimension_semantics = [#tpu.dimension_semantics<parallel>], iteration_bounds = array<i64: 1>, scalar_prefetch = 0 : i64, scratch_operands = 0 : i64, tpu.core_type = #tpu.core_type<tc>, window_params = [{transform_indices = @transform_0, window_bounds = array<i64: 16, 32>}, {pipeline_mode = #tpu.pipeline_mode<synchronous>, transform_indices = @transform_1, window_bounds = array<i64: 1, 32>}, {pipeline_mode = #tpu.pipeline_mode<synchronous>, transform_indices = @transform_2, window_bounds = array<i64: 1, 32>}, {transform_indices = @transform_3, window_bounds = array<i64: 16, 32>}]} {
    %c0 = arith.constant 0 : index
    %c0_0 = arith.constant 0 : index
    %0 = vector.load %arg1[%c0, %c0_0] : memref<16x32xf32, #tpu.memory_space<vmem>>, vector<16x32xf32>
    %c0_1 = arith.constant 0 : index
    %c0_2 = arith.constant 0 : index
    %1 = vector.load %arg2[%c0_1, %c0_2] : memref<1x32xf32, #tpu.memory_space<vmem>>, vector<1x32xf32>
    %c0_3 = arith.constant 0 : index
    %c0_4 = arith.constant 0 : index
    %2 = vector.load %arg3[%c0_3, %c0_4] : memref<1x32xf32, #tpu.memory_space<vmem>>, vector<1x32xf32>
    %cst = arith.constant dense<0.000000e+00> : vector<16xf32>
    %3 = vector.multi_reduction <add>, %0, %cst [1] : vector<16x32xf32> to vector<16xf32>
    %4 = vector.shape_cast %3 : vector<16xf32> to vector<16x1xf32>
    %cst_5 = arith.constant 3.200000e+01 : f32
    %5 = vector.broadcast %cst_5 : f32 to vector<16x1xf32>
    %6 = arith.divf %4, %5 : vector<16x1xf32>
    %7 = vector.broadcast %6 : vector<16x1xf32> to vector<16x32xf32>
    %8 = arith.subf %0, %7 : vector<16x32xf32>
    %9 = arith.mulf %8, %8 : vector<16x32xf32>
    %cst_6 = arith.constant dense<0.000000e+00> : vector<16xf32>
    %10 = vector.multi_reduction <add>, %9, %cst_6 [1] : vector<16x32xf32> to vector<16xf32>
    %11 = vector.shape_cast %10 : vector<16xf32> to vector<16x1xf32>
    %cst_7 = arith.constant 3.200000e+01 : f32
    %12 = vector.broadcast %cst_7 : f32 to vector<16x1xf32>
    %13 = arith.divf %11, %12 : vector<16x1xf32>
    %cst_8 = arith.constant 9.99999974E-6 : f32
    %14 = vector.broadcast %cst_8 : f32 to vector<16x1xf32>
    %15 = arith.addf %13, %14 : vector<16x1xf32>
    %16 = math.rsqrt %15 : vector<16x1xf32>
    %17 = vector.broadcast %16 : vector<16x1xf32> to vector<16x32xf32>
    %18 = arith.mulf %8, %17 : vector<16x32xf32>
    %19 = vector.broadcast %1 : vector<1x32xf32> to vector<16x32xf32>
    %20 = arith.mulf %18, %19 : vector<16x32xf32>
    %21 = vector.broadcast %2 : vector<1x32xf32> to vector<16x32xf32>
    %22 = arith.addf %20, %21 : vector<16x32xf32>
    %23 = arith.truncf %22 : vector<16x32xf32> to vector<16x32xbf16>
    %c0_9 = arith.constant 0 : index
    %c0_10 = arith.constant 0 : index
    %24 = vector.load %arg4[%c0_9, %c0_10] : memref<16x32xbf16, #tpu.memory_space<vmem>>, vector<16x32xbf16>
    tpu.vector_store %arg4[%c0_9, %c0_10], %23 {strides = array<i32>} : memref<16x32xbf16, #tpu.memory_space<vmem>>, vector<16x32xbf16>,
    return
  }
  func.func @transform_0(%arg0: i32) -> (i32, i32) {
    %c0_i32 = arith.constant 0 : i32
    %c0_i32_0 = arith.constant 0 : i32
    return %arg0, %c0_i32 : i32, i32
  }
  func.func @transform_1(%arg0: i32) -> (i32, i32) {
    %c0_i32 = arith.constant 0 : i32
    %c0_i32_0 = arith.constant 0 : i32
    %c0_i32_1 = arith.constant 0 : i32
    return %c0_i32, %c0_i32_0 : i32, i32
  }
  func.func @transform_2(%arg0: i32) -> (i32, i32) {
    %c0_i32 = arith.constant 0 : i32
    %c0_i32_0 = arith.constant 0 : i32
    %c0_i32_1 = arith.constant 0 : i32
    return %c0_i32, %c0_i32_0 : i32, i32
  }
  func.func @transform_3(%arg0: i32) -> (i32, i32) {
    %c0_i32 = arith.constant 0 : i32
    %c0_i32_0 = arith.constant 0 : i32
    return %arg0, %c0_i32 : i32, i32
  }
}

module attributes {stable_mosaic.version = 11 : i64} {
  func.func @_linear_kernel(%arg0: i32, %arg1: i32, %arg2: i32, %arg3: memref<16x32xbf16, #tpu.memory_space<vmem>>, %arg4: memref<32x32xbf16, #tpu.memory_space<vmem>>, %arg5: memref<1x32xf32, #tpu.memory_space<vmem>>, %arg6: memref<16x32xbf16, #tpu.memory_space<vmem>>, %arg7: memref<16x32xf32, #tpu.memory_space<vmem>>) attributes {dimension_semantics = [#tpu.dimension_semantics<parallel>, #tpu.dimension_semantics<parallel>, #tpu.dimension_semantics<arbitrary>], iteration_bounds = array<i64: 1, 1, 1>, scalar_prefetch = 0 : i64, scratch_operands = 1 : i64, tpu.core_type = #tpu.core_type<tc>, window_params = [{transform_indices = @transform_0, window_bounds = array<i64: 16, 32>}, {transform_indices = @transform_1, window_bounds = array<i64: 32, 32>}, {transform_indices = @transform_2, window_bounds = array<i64: 1, 32>}, {transform_indices = @transform_3, window_bounds = array<i64: 16, 32>}]} {
    %c0_i32 = arith.constant 0 : i32
    %0 = arith.cmpi eq, %arg2, %c0_i32 : i32
    %1 = arith.extui %0 : i1 to i32
    %c0_i32_0 = arith.constant 0 : i32
    %2 = arith.cmpi ne, %1, %c0_i32_0 : i32
    scf.if %2 {
      %cst_10 = arith.constant 0.000000e+00 : f32
      %12 = vector.broadcast %cst_10 : f32 to vector<16x32xf32>
      %c0_11 = arith.constant 0 : index
      %c0_12 = arith.constant 0 : index
      %13 = vector.load %arg7[%c0_11, %c0_12] : memref<16x32xf32, #tpu.memory_space<vmem>>, vector<16x32xf32>
      tpu.vector_store %arg7[%c0_11, %c0_12], %12 {strides = array<i32>} : memref<16x32xf32, #tpu.memory_space<vmem>>, vector<16x32xf32>,
    } else {
    }
    %c0 = arith.constant 0 : index
    %c0_1 = arith.constant 0 : index
    %3 = vector.load %arg7[%c0, %c0_1] : memref<16x32xf32, #tpu.memory_space<vmem>>, vector<16x32xf32>
    %c0_2 = arith.constant 0 : index
    %c0_3 = arith.constant 0 : index
    %4 = vector.load %arg3[%c0_2, %c0_3] : memref<16x32xbf16, #tpu.memory_space<vmem>>, vector<16x32xbf16>
    %c0_4 = arith.constant 0 : index
    %c0_5 = arith.constant 0 : index
    %5 = vector.load %arg4[%c0_4, %c0_5] : memref<32x32xbf16, #tpu.memory_space<vmem>>, vector<32x32xbf16>
    %cst = arith.constant dense<0.000000e+00> : vector<16x32xf32>
    %6 = tpu.matmul %4, %5, %cst {dimension_numbers = #tpu.dot_dimension_numbers<[1], [0], [0], [1], [0, 0, 1, 1], [], []>} : vector<16x32xbf16>, vector<32x32xbf16>, vector<16x32xf32> -> vector<16x32xf32>
    %7 = arith.addf %3, %6 : vector<16x32xf32>
    %c0_6 = arith.constant 0 : index
    %c0_7 = arith.constant 0 : index
    %8 = vector.load %arg7[%c0_6, %c0_7] : memref<16x32xf32, #tpu.memory_space<vmem>>, vector<16x32xf32>
    tpu.vector_store %arg7[%c0_6, %c0_7], %7 {strides = array<i32>} : memref<16x32xf32, #tpu.memory_space<vmem>>, vector<16x32xf32>,
    %c0_i32_8 = arith.constant 0 : i32
    %9 = arith.cmpi eq, %arg2, %c0_i32_8 : i32
    %10 = arith.extui %9 : i1 to i32
    %c0_i32_9 = arith.constant 0 : i32
    %11 = arith.cmpi ne, %10, %c0_i32_9 : i32
    scf.if %11 {
      %c0_10 = arith.constant 0 : index
      %c0_11 = arith.constant 0 : index
      %12 = vector.load %arg7[%c0_10, %c0_11] : memref<16x32xf32, #tpu.memory_space<vmem>>, vector<16x32xf32>
      %c0_12 = arith.constant 0 : index
      %c0_13 = arith.constant 0 : index
      %13 = vector.load %arg5[%c0_12, %c0_13] : memref<1x32xf32, #tpu.memory_space<vmem>>, vector<1x32xf32>
      %14 = vector.broadcast %13 : vector<1x32xf32> to vector<16x32xf32>
      %15 = arith.addf %12, %14 : vector<16x32xf32>
      %16 = arith.truncf %15 : vector<16x32xf32> to vector<16x32xbf16>
      %c0_14 = arith.constant 0 : index
      %c0_15 = arith.constant 0 : index
      %17 = vector.load %arg6[%c0_14, %c0_15] : memref<16x32xbf16, #tpu.memory_space<vmem>>, vector<16x32xbf16>
      tpu.vector_store %arg6[%c0_14, %c0_15], %16 {strides = array<i32>} : memref<16x32xbf16, #tpu.memory_space<vmem>>, vector<16x32xbf16>,
    } else {
    }
    return
  }
  func.func @transform_0(%arg0: i32, %arg1: i32, %arg2: i32) -> (i32, i32) {
    %c0_i32 = arith.constant 0 : i32
    return %arg0, %arg2 : i32, i32
  }
  func.func @transform_1(%arg0: i32, %arg1: i32, %arg2: i32) -> (i32, i32) {
    %c0_i32 = arith.constant 0 : i32
    return %arg2, %arg1 : i32, i32
  }
  func.func @transform_2(%arg0: i32, %arg1: i32, %arg2: i32) -> (i32, i32) {
    %c0_i32 = arith.constant 0 : i32
    %c0_i32_0 = arith.constant 0 : i32
    return %c0_i32, %arg1 : i32, i32
  }
  func.func @transform_3(%arg0: i32, %arg1: i32, %arg2: i32) -> (i32, i32) {
    %c0_i32 = arith.constant 0 : i32
    return %arg0, %arg1 : i32, i32
  }
}

module attributes {stable_mosaic.version = 11 : i64} {
  func.func @_ln_res_kernel(%arg0: i32, %arg1: memref<16x32xbf16, #tpu.memory_space<vmem>>, %arg2: memref<16x32xbf16, #tpu.memory_space<vmem>>, %arg3: memref<1x32xf32, #tpu.memory_space<vmem>>, %arg4: memref<1x32xf32, #tpu.memory_space<vmem>>, %arg5: memref<16x32xbf16, #tpu.memory_space<vmem>>) attributes {dimension_semantics = [#tpu.dimension_semantics<parallel>], iteration_bounds = array<i64: 1>, scalar_prefetch = 0 : i64, scratch_operands = 0 : i64, tpu.core_type = #tpu.core_type<tc>, window_params = [{transform_indices = @transform_0, window_bounds = array<i64: 16, 32>}, {transform_indices = @transform_1, window_bounds = array<i64: 16, 32>}, {pipeline_mode = #tpu.pipeline_mode<synchronous>, transform_indices = @transform_2, window_bounds = array<i64: 1, 32>}, {pipeline_mode = #tpu.pipeline_mode<synchronous>, transform_indices = @transform_3, window_bounds = array<i64: 1, 32>}, {transform_indices = @transform_4, window_bounds = array<i64: 16, 32>}]} {
    %c0 = arith.constant 0 : index
    %c0_0 = arith.constant 0 : index
    %0 = vector.load %arg1[%c0, %c0_0] : memref<16x32xbf16, #tpu.memory_space<vmem>>, vector<16x32xbf16>
    %1 = arith.extf %0 : vector<16x32xbf16> to vector<16x32xf32>
    %c0_1 = arith.constant 0 : index
    %c0_2 = arith.constant 0 : index
    %2 = vector.load %arg2[%c0_1, %c0_2] : memref<16x32xbf16, #tpu.memory_space<vmem>>, vector<16x32xbf16>
    %3 = arith.extf %2 : vector<16x32xbf16> to vector<16x32xf32>
    %4 = arith.addf %1, %3 : vector<16x32xf32>
    %c0_3 = arith.constant 0 : index
    %c0_4 = arith.constant 0 : index
    %5 = vector.load %arg3[%c0_3, %c0_4] : memref<1x32xf32, #tpu.memory_space<vmem>>, vector<1x32xf32>
    %c0_5 = arith.constant 0 : index
    %c0_6 = arith.constant 0 : index
    %6 = vector.load %arg4[%c0_5, %c0_6] : memref<1x32xf32, #tpu.memory_space<vmem>>, vector<1x32xf32>
    %cst = arith.constant dense<0.000000e+00> : vector<16xf32>
    %7 = vector.multi_reduction <add>, %4, %cst [1] : vector<16x32xf32> to vector<16xf32>
    %8 = vector.shape_cast %7 : vector<16xf32> to vector<16x1xf32>
    %cst_7 = arith.constant 3.200000e+01 : f32
    %9 = vector.broadcast %cst_7 : f32 to vector<16x1xf32>
    %10 = arith.divf %8, %9 : vector<16x1xf32>
    %11 = vector.broadcast %10 : vector<16x1xf32> to vector<16x32xf32>
    %12 = arith.subf %4, %11 : vector<16x32xf32>
    %13 = arith.mulf %12, %12 : vector<16x32xf32>
    %cst_8 = arith.constant dense<0.000000e+00> : vector<16xf32>
    %14 = vector.multi_reduction <add>, %13, %cst_8 [1] : vector<16x32xf32> to vector<16xf32>
    %15 = vector.shape_cast %14 : vector<16xf32> to vector<16x1xf32>
    %cst_9 = arith.constant 3.200000e+01 : f32
    %16 = vector.broadcast %cst_9 : f32 to vector<16x1xf32>
    %17 = arith.divf %15, %16 : vector<16x1xf32>
    %cst_10 = arith.constant 9.99999974E-6 : f32
    %18 = vector.broadcast %cst_10 : f32 to vector<16x1xf32>
    %19 = arith.addf %17, %18 : vector<16x1xf32>
    %20 = math.rsqrt %19 : vector<16x1xf32>
    %21 = vector.broadcast %20 : vector<16x1xf32> to vector<16x32xf32>
    %22 = arith.mulf %12, %21 : vector<16x32xf32>
    %23 = vector.broadcast %5 : vector<1x32xf32> to vector<16x32xf32>
    %24 = arith.mulf %22, %23 : vector<16x32xf32>
    %25 = vector.broadcast %6 : vector<1x32xf32> to vector<16x32xf32>
    %26 = arith.addf %24, %25 : vector<16x32xf32>
    %27 = arith.truncf %26 : vector<16x32xf32> to vector<16x32xbf16>
    %c0_11 = arith.constant 0 : index
    %c0_12 = arith.constant 0 : index
    %28 = vector.load %arg5[%c0_11, %c0_12] : memref<16x32xbf16, #tpu.memory_space<vmem>>, vector<16x32xbf16>
    tpu.vector_store %arg5[%c0_11, %c0_12], %27 {strides = array<i32>} : memref<16x32xbf16, #tpu.memory_space<vmem>>, vector<16x32xbf16>,
    return
  }
  func.func @transform_0(%arg0: i32) -> (i32, i32) {
    %c0_i32 = arith.constant 0 : i32
    %c0_i32_0 = arith.constant 0 : i32
    return %arg0, %c0_i32 : i32, i32
  }
  func.func @transform_1(%arg0: i32) -> (i32, i32) {
    %c0_i32 = arith.constant 0 : i32
    %c0_i32_0 = arith.constant 0 : i32
    return %arg0, %c0_i32 : i32, i32
  }
  func.func @transform_2(%arg0: i32) -> (i32, i32) {
    %c0_i32 = arith.constant 0 : i32
    %c0_i32_0 = arith.constant 0 : i32
    %c0_i32_1 = arith.constant 0 : i32
    return %c0_i32, %c0_i32_0 : i32, i32
  }
  func.func @transform_3(%arg0: i32) -> (i32, i32) {
    %c0_i32 = arith.constant 0 : i32
    %c0_i32_0 = arith.constant 0 : i32
    %c0_i32_1 = arith.constant 0 : i32
    return %c0_i32, %c0_i32_0 : i32, i32
  }
  func.func @transform_4(%arg0: i32) -> (i32, i32) {
    %c0_i32 = arith.constant 0 : i32
    %c0_i32_0 = arith.constant 0 : i32
    return %arg0, %c0_i32 : i32, i32
  }
}

module attributes {stable_mosaic.version = 11 : i64} {
  func.func @_linear_kernel(%arg0: i32, %arg1: i32, %arg2: i32, %arg3: memref<16x32xbf16, #tpu.memory_space<vmem>>, %arg4: memref<32x64xbf16, #tpu.memory_space<vmem>>, %arg5: memref<1x64xf32, #tpu.memory_space<vmem>>, %arg6: memref<16x64xbf16, #tpu.memory_space<vmem>>, %arg7: memref<16x64xf32, #tpu.memory_space<vmem>>) attributes {dimension_semantics = [#tpu.dimension_semantics<parallel>, #tpu.dimension_semantics<parallel>, #tpu.dimension_semantics<arbitrary>], iteration_bounds = array<i64: 1, 1, 1>, scalar_prefetch = 0 : i64, scratch_operands = 1 : i64, tpu.core_type = #tpu.core_type<tc>, window_params = [{transform_indices = @transform_0, window_bounds = array<i64: 16, 32>}, {transform_indices = @transform_1, window_bounds = array<i64: 32, 64>}, {transform_indices = @transform_2, window_bounds = array<i64: 1, 64>}, {transform_indices = @transform_3, window_bounds = array<i64: 16, 64>}]} {
    %c0_i32 = arith.constant 0 : i32
    %0 = arith.cmpi eq, %arg2, %c0_i32 : i32
    %1 = arith.extui %0 : i1 to i32
    %c0_i32_0 = arith.constant 0 : i32
    %2 = arith.cmpi ne, %1, %c0_i32_0 : i32
    scf.if %2 {
      %cst_10 = arith.constant 0.000000e+00 : f32
      %12 = vector.broadcast %cst_10 : f32 to vector<16x64xf32>
      %c0_11 = arith.constant 0 : index
      %c0_12 = arith.constant 0 : index
      %13 = vector.load %arg7[%c0_11, %c0_12] : memref<16x64xf32, #tpu.memory_space<vmem>>, vector<16x64xf32>
      tpu.vector_store %arg7[%c0_11, %c0_12], %12 {strides = array<i32>} : memref<16x64xf32, #tpu.memory_space<vmem>>, vector<16x64xf32>,
    } else {
    }
    %c0 = arith.constant 0 : index
    %c0_1 = arith.constant 0 : index
    %3 = vector.load %arg7[%c0, %c0_1] : memref<16x64xf32, #tpu.memory_space<vmem>>, vector<16x64xf32>
    %c0_2 = arith.constant 0 : index
    %c0_3 = arith.constant 0 : index
    %4 = vector.load %arg3[%c0_2, %c0_3] : memref<16x32xbf16, #tpu.memory_space<vmem>>, vector<16x32xbf16>
    %c0_4 = arith.constant 0 : index
    %c0_5 = arith.constant 0 : index
    %5 = vector.load %arg4[%c0_4, %c0_5] : memref<32x64xbf16, #tpu.memory_space<vmem>>, vector<32x64xbf16>
    %cst = arith.constant dense<0.000000e+00> : vector<16x64xf32>
    %6 = tpu.matmul %4, %5, %cst {dimension_numbers = #tpu.dot_dimension_numbers<[1], [0], [0], [1], [0, 0, 1, 1], [], []>} : vector<16x32xbf16>, vector<32x64xbf16>, vector<16x64xf32> -> vector<16x64xf32>
    %7 = arith.addf %3, %6 : vector<16x64xf32>
    %c0_6 = arith.constant 0 : index
    %c0_7 = arith.constant 0 : index
    %8 = vector.load %arg7[%c0_6, %c0_7] : memref<16x64xf32, #tpu.memory_space<vmem>>, vector<16x64xf32>
    tpu.vector_store %arg7[%c0_6, %c0_7], %7 {strides = array<i32>} : memref<16x64xf32, #tpu.memory_space<vmem>>, vector<16x64xf32>,
    %c0_i32_8 = arith.constant 0 : i32
    %9 = arith.cmpi eq, %arg2, %c0_i32_8 : i32
    %10 = arith.extui %9 : i1 to i32
    %c0_i32_9 = arith.constant 0 : i32
    %11 = arith.cmpi ne, %10, %c0_i32_9 : i32
    scf.if %11 {
      %c0_10 = arith.constant 0 : index
      %c0_11 = arith.constant 0 : index
      %12 = vector.load %arg7[%c0_10, %c0_11] : memref<16x64xf32, #tpu.memory_space<vmem>>, vector<16x64xf32>
      %c0_12 = arith.constant 0 : index
      %c0_13 = arith.constant 0 : index
      %13 = vector.load %arg5[%c0_12, %c0_13] : memref<1x64xf32, #tpu.memory_space<vmem>>, vector<1x64xf32>
      %14 = vector.broadcast %13 : vector<1x64xf32> to vector<16x64xf32>
      %15 = arith.addf %12, %14 : vector<16x64xf32>
      %16 = arith.mulf %15, %15 : vector<16x64xf32>
      %17 = arith.mulf %15, %16 : vector<16x64xf32>
      %cst_14 = arith.constant 4.471500e-02 : f32
      %18 = vector.broadcast %cst_14 : f32 to vector<16x64xf32>
      %19 = arith.mulf %18, %17 : vector<16x64xf32>
      %20 = arith.addf %15, %19 : vector<16x64xf32>
      %cst_15 = arith.constant 0.797884583 : f32
      %21 = vector.broadcast %cst_15 : f32 to vector<16x64xf32>
      %22 = arith.mulf %21, %20 : vector<16x64xf32>
      %23 = math.tanh %22 : vector<16x64xf32>
      %cst_16 = arith.constant 1.000000e+00 : f32
      %24 = vector.broadcast %cst_16 : f32 to vector<16x64xf32>
      %25 = arith.addf %24, %23 : vector<16x64xf32>
      %cst_17 = arith.constant 5.000000e-01 : f32
      %26 = vector.broadcast %cst_17 : f32 to vector<16x64xf32>
      %27 = arith.mulf %26, %25 : vector<16x64xf32>
      %28 = arith.mulf %15, %27 : vector<16x64xf32>
      %29 = arith.truncf %28 : vector<16x64xf32> to vector<16x64xbf16>
      %c0_18 = arith.constant 0 : index
      %c0_19 = arith.constant 0 : index
      %30 = vector.load %arg6[%c0_18, %c0_19] : memref<16x64xbf16, #tpu.memory_space<vmem>>, vector<16x64xbf16>
      tpu.vector_store %arg6[%c0_18, %c0_19], %29 {strides = array<i32>} : memref<16x64xbf16, #tpu.memory_space<vmem>>, vector<16x64xbf16>,
    } else {
    }
    return
  }
  func.func @transform_0(%arg0: i32, %arg1: i32, %arg2: i32) -> (i32, i32) {
    %c0_i32 = arith.constant 0 : i32
    return %arg0, %arg2 : i32, i32
  }
  func.func @transform_1(%arg0: i32, %arg1: i32, %arg2: i32) -> (i32, i32) {
    %c0_i32 = arith.constant 0 : i32
    return %arg2, %arg1 : i32, i32
  }
  func.func @transform_2(%arg0: i32, %arg1: i32, %arg2: i32) -> (i32, i32) {
    %c0_i32 = arith.constant 0 : i32
    %c0_i32_0 = arith.constant 0 : i32
    return %c0_i32, %arg1 : i32, i32
  }
  func.func @transform_3(%arg0: i32, %arg1: i32, %arg2: i32) -> (i32, i32) {
    %c0_i32 = arith.constant 0 : i32
    return %arg0, %arg1 : i32, i32
  }
}

module attributes {stable_mosaic.version = 11 : i64} {
  func.func @_attn_collect_kernel(%arg0: i32, %arg1: i32, %arg2: memref<1x8x96xbf16, #tpu.memory_space<vmem>>, %arg3: memref<1x8x96xbf16, #tpu.memory_space<vmem>>, %arg4: memref<1x1x8xf32, #tpu.memory_space<vmem>>, %arg5: memref<1x8x32xbf16, #tpu.memory_space<vmem>>, %arg6: memref<1x1x8xf32, #tpu.memory_space<vmem>>) attributes {dimension_semantics = [#tpu.dimension_semantics<parallel>, #tpu.dimension_semantics<arbitrary>], iteration_bounds = array<i64: 2, 1>, scalar_prefetch = 0 : i64, scratch_operands = 0 : i64, tpu.core_type = #tpu.core_type<tc>, window_params = [{transform_indices = @transform_0, window_bounds = array<i64: 1, 8, 96>}, {transform_indices = @transform_1, window_bounds = array<i64: 1, 8, 96>}, {transform_indices = @transform_2, window_bounds = array<i64: 1, 1, 8>}, {transform_indices = @transform_3, window_bounds = array<i64: 1, 8, 32>}, {transform_indices = @transform_4, window_bounds = array<i64: 1, 1, 8>}]} {
    %c0 = arith.constant 0 : index
    %c0_0 = arith.constant 0 : index
    %c0_1 = arith.constant 0 : index
    %0 = vector.load %arg2[%c0, %c0_0, %c0_1] : memref<1x8x96xbf16, #tpu.memory_space<vmem>>, vector<1x8x96xbf16>
    %1 = vector.shape_cast %0 : vector<1x8x96xbf16> to vector<8x96xbf16>
    %c0_2 = arith.constant 0 : index
    %c0_3 = arith.constant 0 : index
    %c0_4 = arith.constant 0 : index
    %2 = vector.load %arg3[%c0_2, %c0_3, %c0_4] : memref<1x8x96xbf16, #tpu.memory_space<vmem>>, vector<1x8x96xbf16>
    %3 = vector.shape_cast %2 : vector<1x8x96xbf16> to vector<8x96xbf16>
    %c0_5 = arith.constant 0 : index
    %c0_6 = arith.constant 0 : index
    %c0_7 = arith.constant 0 : index
    %4 = vector.load %arg4[%c0_5, %c0_6, %c0_7] : memref<1x1x8xf32, #tpu.memory_space<vmem>>, vector<1x1x8xf32>
    %5 = vector.shape_cast %4 : vector<1x1x8xf32> to vector<1x8xf32>
    %6 = vector.extract_strided_slice %1 {offsets = [0, 0], sizes = [8, 32], strides = [1, 1]} : vector<8x96xbf16> to vector<8x32xbf16>
    %7 = arith.extf %6 : vector<8x32xbf16> to vector<8x32xf32>
    %cst = arith.constant 0.353553385 : f32
    %8 = vector.broadcast %cst : f32 to vector<8x32xf32>
    %9 = arith.mulf %7, %8 : vector<8x32xf32>
    %10 = arith.truncf %9 : vector<8x32xf32> to vector<8x32xbf16>
    %11 = vector.extract_strided_slice %10 {offsets = [0, 0], sizes = [8, 8], strides = [1, 1]} : vector<8x32xbf16> to vector<8x8xbf16>
    %12 = vector.extract_strided_slice %3 {offsets = [0, 32], sizes = [8, 8], strides = [1, 1]} : vector<8x96xbf16> to vector<8x8xbf16>
    %13 = vector.extract_strided_slice %3 {offsets = [0, 64], sizes = [8, 8], strides = [1, 1]} : vector<8x96xbf16> to vector<8x8xbf16>
    %cst_8 = arith.constant dense<0.000000e+00> : vector<8x8xf32>
    %14 = tpu.matmul %11, %12, %cst_8 {dimension_numbers = #tpu.dot_dimension_numbers<[1], [1], [0], [0], [0, 0, 1, 0], [], []>} : vector<8x8xbf16>, vector<8x8xbf16>, vector<8x8xf32> -> vector<8x8xf32>
    %15 = vector.broadcast %5 : vector<1x8xf32> to vector<8x8xf32>
    %16 = arith.addf %14, %15 : vector<8x8xf32>
    %cst_9 = arith.constant dense<0xFF800000> : vector<8xf32>
    %17 = vector.multi_reduction <maximumf>, %16, %cst_9 [1] : vector<8x8xf32> to vector<8xf32>
    %18 = vector.shape_cast %17 : vector<8xf32> to vector<8x1xf32>
    %19 = vector.broadcast %18 : vector<8x1xf32> to vector<8x8xf32>
    %20 = arith.subf %16, %19 : vector<8x8xf32>
    %21 = math.exp %20 : vector<8x8xf32>
    %cst_10 = arith.constant dense<0.000000e+00> : vector<8xf32>
    %22 = vector.multi_reduction <add>, %21, %cst_10 [1] : vector<8x8xf32> to vector<8xf32>
    %23 = vector.shape_cast %22 : vector<8xf32> to vector<8x1xf32>
    %24 = tpu.reciprocal %23 {approx = true} : vector<8x1xf32> -> vector<8x1xf32>
    %25 = vector.broadcast %24 : vector<8x1xf32> to vector<8x8xf32>
    %26 = arith.mulf %21, %25 : vector<8x8xf32>
    %27 = arith.truncf %26 : vector<8x8xf32> to vector<8x8xbf16>
    %cst_11 = arith.constant dense<0.000000e+00> : vector<8x8xf32>
    %28 = tpu.matmul %27, %13, %cst_11 {dimension_numbers = #tpu.dot_dimension_numbers<[1], [0], [0], [1], [0, 0, 1, 1], [], []>} : vector<8x8xbf16>, vector<8x8xbf16>, vector<8x8xf32> -> vector<8x8xf32>
    %29 = vector.extract_strided_slice %26 {offsets = [0, 0], sizes = [1, 8], strides = [1, 1]} : vector<8x8xf32> to vector<1x8xf32>
    %30 = vector.extract_strided_slice %10 {offsets = [0, 8], sizes = [8, 8], strides = [1, 1]} : vector<8x32xbf16> to vector<8x8xbf16>
    %31 = vector.extract_strided_slice %3 {offsets = [0, 40], sizes = [8, 8], strides = [1, 1]} : vector<8x96xbf16> to vector<8x8xbf16>
    %32 = vector.extract_strided_slice %3 {offsets = [0, 72], sizes = [8, 8], strides = [1, 1]} : vector<8x96xbf16> to vector<8x8xbf16>
    %cst_12 = arith.constant dense<0.000000e+00> : vector<8x8xf32>
    %33 = tpu.matmul %30, %31, %cst_12 {dimension_numbers = #tpu.dot_dimension_numbers<[1], [1], [0], [0], [0, 0, 1, 0], [], []>} : vector<8x8xbf16>, vector<8x8xbf16>, vector<8x8xf32> -> vector<8x8xf32>
    %34 = vector.broadcast %5 : vector<1x8xf32> to vector<8x8xf32>
    %35 = arith.addf %33, %34 : vector<8x8xf32>
    %cst_13 = arith.constant dense<0xFF800000> : vector<8xf32>
    %36 = vector.multi_reduction <maximumf>, %35, %cst_13 [1] : vector<8x8xf32> to vector<8xf32>
    %37 = vector.shape_cast %36 : vector<8xf32> to vector<8x1xf32>
    %38 = vector.broadcast %37 : vector<8x1xf32> to vector<8x8xf32>
    %39 = arith.subf %35, %38 : vector<8x8xf32>
    %40 = math.exp %39 : vector<8x8xf32>
    %cst_14 = arith.constant dense<0.000000e+00> : vector<8xf32>
    %41 = vector.multi_reduction <add>, %40, %cst_14 [1] : vector<8x8xf32> to vector<8xf32>
    %42 = vector.shape_cast %41 : vector<8xf32> to vector<8x1xf32>
    %43 = tpu.reciprocal %42 {approx = true} : vector<8x1xf32> -> vector<8x1xf32>
    %44 = vector.broadcast %43 : vector<8x1xf32> to vector<8x8xf32>
    %45 = arith.mulf %40, %44 : vector<8x8xf32>
    %46 = arith.truncf %45 : vector<8x8xf32> to vector<8x8xbf16>
    %cst_15 = arith.constant dense<0.000000e+00> : vector<8x8xf32>
    %47 = tpu.matmul %46, %32, %cst_15 {dimension_numbers = #tpu.dot_dimension_numbers<[1], [0], [0], [1], [0, 0, 1, 1], [], []>} : vector<8x8xbf16>, vector<8x8xbf16>, vector<8x8xf32> -> vector<8x8xf32>
    %48 = vector.extract_strided_slice %45 {offsets = [0, 0], sizes = [1, 8], strides = [1, 1]} : vector<8x8xf32> to vector<1x8xf32>
    %49 = arith.addf %29, %48 : vector<1x8xf32>
    %50 = vector.extract_strided_slice %10 {offsets = [0, 16], sizes = [8, 8], strides = [1, 1]} : vector<8x32xbf16> to vector<8x8xbf16>
    %51 = vector.extract_strided_slice %3 {offsets = [0, 48], sizes = [8, 8], strides = [1, 1]} : vector<8x96xbf16> to vector<8x8xbf16>
    %52 = vector.extract_strided_slice %3 {offsets = [0, 80], sizes = [8, 8], strides = [1, 1]} : vector<8x96xbf16> to vector<8x8xbf16>
    %cst_16 = arith.constant dense<0.000000e+00> : vector<8x8xf32>
    %53 = tpu.matmul %50, %51, %cst_16 {dimension_numbers = #tpu.dot_dimension_numbers<[1], [1], [0], [0], [0, 0, 1, 0], [], []>} : vector<8x8xbf16>, vector<8x8xbf16>, vector<8x8xf32> -> vector<8x8xf32>
    %54 = vector.broadcast %5 : vector<1x8xf32> to vector<8x8xf32>
    %55 = arith.addf %53, %54 : vector<8x8xf32>
    %cst_17 = arith.constant dense<0xFF800000> : vector<8xf32>
    %56 = vector.multi_reduction <maximumf>, %55, %cst_17 [1] : vector<8x8xf32> to vector<8xf32>
    %57 = vector.shape_cast %56 : vector<8xf32> to vector<8x1xf32>
    %58 = vector.broadcast %57 : vector<8x1xf32> to vector<8x8xf32>
    %59 = arith.subf %55, %58 : vector<8x8xf32>
    %60 = math.exp %59 : vector<8x8xf32>
    %cst_18 = arith.constant dense<0.000000e+00> : vector<8xf32>
    %61 = vector.multi_reduction <add>, %60, %cst_18 [1] : vector<8x8xf32> to vector<8xf32>
    %62 = vector.shape_cast %61 : vector<8xf32> to vector<8x1xf32>
    %63 = tpu.reciprocal %62 {approx = true} : vector<8x1xf32> -> vector<8x1xf32>
    %64 = vector.broadcast %63 : vector<8x1xf32> to vector<8x8xf32>
    %65 = arith.mulf %60, %64 : vector<8x8xf32>
    %66 = arith.truncf %65 : vector<8x8xf32> to vector<8x8xbf16>
    %cst_19 = arith.constant dense<0.000000e+00> : vector<8x8xf32>
    %67 = tpu.matmul %66, %52, %cst_19 {dimension_numbers = #tpu.dot_dimension_numbers<[1], [0], [0], [1], [0, 0, 1, 1], [], []>} : vector<8x8xbf16>, vector<8x8xbf16>, vector<8x8xf32> -> vector<8x8xf32>
    %68 = vector.extract_strided_slice %65 {offsets = [0, 0], sizes = [1, 8], strides = [1, 1]} : vector<8x8xf32> to vector<1x8xf32>
    %69 = arith.addf %49, %68 : vector<1x8xf32>
    %70 = vector.extract_strided_slice %10 {offsets = [0, 24], sizes = [8, 8], strides = [1, 1]} : vector<8x32xbf16> to vector<8x8xbf16>
    %71 = vector.extract_strided_slice %3 {offsets = [0, 56], sizes = [8, 8], strides = [1, 1]} : vector<8x96xbf16> to vector<8x8xbf16>
    %72 = vector.extract_strided_slice %3 {offsets = [0, 88], sizes = [8, 8], strides = [1, 1]} : vector<8x96xbf16> to vector<8x8xbf16>
    %cst_20 = arith.constant dense<0.000000e+00> : vector<8x8xf32>
    %73 = tpu.matmul %70, %71, %cst_20 {dimension_numbers = #tpu.dot_dimension_numbers<[1], [1], [0], [0], [0, 0, 1, 0], [], []>} : vector<8x8xbf16>, vector<8x8xbf16>, vector<8x8xf32> -> vector<8x8xf32>
    %74 = vector.broadcast %5 : vector<1x8xf32> to vector<8x8xf32>
    %75 = arith.addf %73, %74 : vector<8x8xf32>
    %cst_21 = arith.constant dense<0xFF800000> : vector<8xf32>
    %76 = vector.multi_reduction <maximumf>, %75, %cst_21 [1] : vector<8x8xf32> to vector<8xf32>
    %77 = vector.shape_cast %76 : vector<8xf32> to vector<8x1xf32>
    %78 = vector.broadcast %77 : vector<8x1xf32> to vector<8x8xf32>
    %79 = arith.subf %75, %78 : vector<8x8xf32>
    %80 = math.exp %79 : vector<8x8xf32>
    %cst_22 = arith.constant dense<0.000000e+00> : vector<8xf32>
    %81 = vector.multi_reduction <add>, %80, %cst_22 [1] : vector<8x8xf32> to vector<8xf32>
    %82 = vector.shape_cast %81 : vector<8xf32> to vector<8x1xf32>
    %83 = tpu.reciprocal %82 {approx = true} : vector<8x1xf32> -> vector<8x1xf32>
    %84 = vector.broadcast %83 : vector<8x1xf32> to vector<8x8xf32>
    %85 = arith.mulf %80, %84 : vector<8x8xf32>
    %86 = arith.truncf %85 : vector<8x8xf32> to vector<8x8xbf16>
    %cst_23 = arith.constant dense<0.000000e+00> : vector<8x8xf32>
    %87 = tpu.matmul %86, %72, %cst_23 {dimension_numbers = #tpu.dot_dimension_numbers<[1], [0], [0], [1], [0, 0, 1, 1], [], []>} : vector<8x8xbf16>, vector<8x8xbf16>, vector<8x8xf32> -> vector<8x8xf32>
    %88 = vector.extract_strided_slice %85 {offsets = [0, 0], sizes = [1, 8], strides = [1, 1]} : vector<8x8xf32> to vector<1x8xf32>
    %89 = arith.addf %69, %88 : vector<1x8xf32>
    %90 = tpu.concatenate %28, %47, %67, %87 in 1 : vector<8x8xf32>, vector<8x8xf32>, vector<8x8xf32>, vector<8x8xf32> -> vector<8x32xf32>
    %91 = arith.truncf %90 : vector<8x32xf32> to vector<8x32xbf16>
    %c0_24 = arith.constant 0 : index
    %c0_25 = arith.constant 0 : index
    %c0_26 = arith.constant 0 : index
    %92 = vector.load %arg5[%c0_24, %c0_25, %c0_26] : memref<1x8x32xbf16, #tpu.memory_space<vmem>>, vector<1x8x32xbf16>
    %93 = vector.shape_cast %92 : vector<1x8x32xbf16> to vector<8x32xbf16>
    %94 = vector.shape_cast %91 : vector<8x32xbf16> to vector<1x8x32xbf16>
    tpu.vector_store %arg5[%c0_24, %c0_25, %c0_26], %94 {strides = array<i32>} : memref<1x8x32xbf16, #tpu.memory_space<vmem>>, vector<1x8x32xbf16>,
    %c0_i32 = arith.constant 0 : i32
    %95 = arith.cmpi eq, %arg1, %c0_i32 : i32
    %96 = arith.extui %95 : i1 to i32
    %c0_i32_27 = arith.constant 0 : i32
    %97 = arith.cmpi ne, %96, %c0_i32_27 : i32
    scf.if %97 {
      %c0_28 = arith.constant 0 : index
      %c0_29 = arith.constant 0 : index
      %c0_30 = arith.constant 0 : index
      %98 = vector.load %arg6[%c0_28, %c0_29, %c0_30] : memref<1x1x8xf32, #tpu.memory_space<vmem>>, vector<1x1x8xf32>
      %99 = vector.shape_cast %98 : vector<1x1x8xf32> to vector<1x8xf32>
      %100 = vector.shape_cast %89 : vector<1x8xf32> to vector<1x1x8xf32>
      tpu.vector_store %arg6[%c0_28, %c0_29, %c0_30], %100 {strides = array<i32>} : memref<1x1x8xf32, #tpu.memory_space<vmem>>, vector<1x1x8xf32>,
    } else {
    }
    return
  }
  func.func @transform_0(%arg0: i32, %arg1: i32) -> (i32, i32, i32) {
    %c0_i32 = arith.constant 0 : i32
    %c0_i32_0 = arith.constant 0 : i32
    return %arg0, %arg1, %c0_i32 : i32, i32, i32
  }
  func.func @transform_1(%arg0: i32, %arg1: i32) -> (i32, i32, i32) {
    %c0_i32 = arith.constant 0 : i32
    %c0_i32_0 = arith.constant 0 : i32
    %c0_i32_1 = arith.constant 0 : i32
    return %arg0, %c0_i32, %c0_i32_0 : i32, i32, i32
  }
  func.func @transform_2(%arg0: i32, %arg1: i32) -> (i32, i32, i32) {
    %c0_i32 = arith.constant 0 : i32
    %c0_i32_0 = arith.constant 0 : i32
    %c0_i32_1 = arith.constant 0 : i32
    return %arg0, %c0_i32, %c0_i32_0 : i32, i32, i32
  }
  func.func @transform_3(%arg0: i32, %arg1: i32) -> (i32, i32, i32) {
    %c0_i32 = arith.constant 0 : i32
    %c0_i32_0 = arith.constant 0 : i32
    return %arg0, %arg1, %c0_i32 : i32, i32, i32
  }
  func.func @transform_4(%arg0: i32, %arg1: i32) -> (i32, i32, i32) {
    %c0_i32 = arith.constant 0 : i32
    %c0_i32_0 = arith.constant 0 : i32
    %c0_i32_1 = arith.constant 0 : i32
    return %arg0, %c0_i32, %c0_i32_0 : i32, i32, i32
  }
}

module attributes {stable_mosaic.version = 11 : i64} {
  func.func @_linear_kernel(%arg0: i32, %arg1: i32, %arg2: i32, %arg3: memref<16x64xbf16, #tpu.memory_space<vmem>>, %arg4: memref<64x32xbf16, #tpu.memory_space<vmem>>, %arg5: memref<1x32xf32, #tpu.memory_space<vmem>>, %arg6: memref<16x32xbf16, #tpu.memory_space<vmem>>, %arg7: memref<16x32xf32, #tpu.memory_space<vmem>>) attributes {dimension_semantics = [#tpu.dimension_semantics<parallel>, #tpu.dimension_semantics<parallel>, #tpu.dimension_semantics<arbitrary>], iteration_bounds = array<i64: 1, 1, 1>, scalar_prefetch = 0 : i64, scratch_operands = 1 : i64, tpu.core_type = #tpu.core_type<tc>, window_params = [{transform_indices = @transform_0, window_bounds = array<i64: 16, 64>}, {transform_indices = @transform_1, window_bounds = array<i64: 64, 32>}, {transform_indices = @transform_2, window_bounds = array<i64: 1, 32>}, {transform_indices = @transform_3, window_bounds = array<i64: 16, 32>}]} {
    %c0_i32 = arith.constant 0 : i32
    %0 = arith.cmpi eq, %arg2, %c0_i32 : i32
    %1 = arith.extui %0 : i1 to i32
    %c0_i32_0 = arith.constant 0 : i32
    %2 = arith.cmpi ne, %1, %c0_i32_0 : i32
    scf.if %2 {
      %cst_10 = arith.constant 0.000000e+00 : f32
      %12 = vector.broadcast %cst_10 : f32 to vector<16x32xf32>
      %c0_11 = arith.constant 0 : index
      %c0_12 = arith.constant 0 : index
      %13 = vector.load %arg7[%c0_11, %c0_12] : memref<16x32xf32, #tpu.memory_space<vmem>>, vector<16x32xf32>
      tpu.vector_store %arg7[%c0_11, %c0_12], %12 {strides = array<i32>} : memref<16x32xf32, #tpu.memory_space<vmem>>, vector<16x32xf32>,
    } else {
    }
    %c0 = arith.constant 0 : index
    %c0_1 = arith.constant 0 : index
    %3 = vector.load %arg7[%c0, %c0_1] : memref<16x32xf32, #tpu.memory_space<vmem>>, vector<16x32xf32>
    %c0_2 = arith.constant 0 : index
    %c0_3 = arith.constant 0 : index
    %4 = vector.load %arg3[%c0_2, %c0_3] : memref<16x64xbf16, #tpu.memory_space<vmem>>, vector<16x64xbf16>
    %c0_4 = arith.constant 0 : index
    %c0_5 = arith.constant 0 : index
    %5 = vector.load %arg4[%c0_4, %c0_5] : memref<64x32xbf16, #tpu.memory_space<vmem>>, vector<64x32xbf16>
    %cst = arith.constant dense<0.000000e+00> : vector<16x32xf32>
    %6 = tpu.matmul %4, %5, %cst {dimension_numbers = #tpu.dot_dimension_numbers<[1], [0], [0], [1], [0, 0, 1, 1], [], []>} : vector<16x64xbf16>, vector<64x32xbf16>, vector<16x32xf32> -> vector<16x32xf32>
    %7 = arith.addf %3, %6 : vector<16x32xf32>
    %c0_6 = arith.constant 0 : index
    %c0_7 = arith.constant 0 : index
    %8 = vector.load %arg7[%c0_6, %c0_7] : memref<16x32xf32, #tpu.memory_space<vmem>>, vector<16x32xf32>
    tpu.vector_store %arg7[%c0_6, %c0_7], %7 {strides = array<i32>} : memref<16x32xf32, #tpu.memory_space<vmem>>, vector<16x32xf32>,
    %c0_i32_8 = arith.constant 0 : i32
    %9 = arith.cmpi eq, %arg2, %c0_i32_8 : i32
    %10 = arith.extui %9 : i1 to i32
    %c0_i32_9 = arith.constant 0 : i32
    %11 = arith.cmpi ne, %10, %c0_i32_9 : i32
    scf.if %11 {
      %c0_10 = arith.constant 0 : index
      %c0_11 = arith.constant 0 : index
      %12 = vector.load %arg7[%c0_10, %c0_11] : memref<16x32xf32, #tpu.memory_space<vmem>>, vector<16x32xf32>
      %c0_12 = arith.constant 0 : index
      %c0_13 = arith.constant 0 : index
      %13 = vector.load %arg5[%c0_12, %c0_13] : memref<1x32xf32, #tpu.memory_space<vmem>>, vector<1x32xf32>
      %14 = vector.broadcast %13 : vector<1x32xf32> to vector<16x32xf32>
      %15 = arith.addf %12, %14 : vector<16x32xf32>
      %16 = arith.truncf %15 : vector<16x32xf32> to vector<16x32xbf16>
      %c0_14 = arith.constant 0 : index
      %c0_15 = arith.constant 0 : index
      %17 = vector.load %arg6[%c0_14, %c0_15] : memref<16x32xbf16, #tpu.memory_space<vmem>>, vector<16x32xbf16>
      tpu.vector_store %arg6[%c0_14, %c0_15], %16 {strides = array<i32>} : memref<16x32xbf16, #tpu.memory_space<vmem>>, vector<16x32xbf16>,
    } else {
    }
    return
  }
  func.func @transform_0(%arg0: i32, %arg1: i32, %arg2: i32) -> (i32, i32) {
    %c0_i32 = arith.constant 0 : i32
    return %arg0, %arg2 : i32, i32
  }
  func.func @transform_1(%arg0: i32, %arg1: i32, %arg2: i32) -> (i32, i32) {
    %c0_i32 = arith.constant 0 : i32
    return %arg2, %arg1 : i32, i32
  }
  func.func @transform_2(%arg0: i32, %arg1: i32, %arg2: i32) -> (i32, i32) {
    %c0_i32 = arith.constant 0 : i32
    %c0_i32_0 = arith.constant 0 : i32
    return %c0_i32, %arg1 : i32, i32
  }
  func.func @transform_3(%arg0: i32, %arg1: i32, %arg2: i32) -> (i32, i32) {
    %c0_i32 = arith.constant 0 : i32
    return %arg0, %arg1 : i32, i32
  }
}

module attributes {stable_mosaic.version = 11 : i64} {
  func.func @_pooler_head_kernel(%arg0: i32, %arg1: memref<2x32xbf16, #tpu.memory_space<vmem>>, %arg2: memref<32x32xbf16, #tpu.memory_space<vmem>>, %arg3: memref<1x32xf32, #tpu.memory_space<vmem>>, %arg4: memref<32x1xbf16, #tpu.memory_space<vmem>>, %arg5: memref<1x1xf32, #tpu.memory_space<vmem>>, %arg6: memref<2x1xf32, #tpu.memory_space<vmem>>) attributes {dimension_semantics = [#tpu.dimension_semantics<arbitrary>], iteration_bounds = array<i64: 1>, scalar_prefetch = 0 : i64, scratch_operands = 0 : i64, tpu.core_type = #tpu.core_type<tc>, window_params = [{pipeline_mode = #tpu.pipeline_mode<synchronous>, transform_indices = @transform_0, window_bounds = array<i64: 2, 32>}, {pipeline_mode = #tpu.pipeline_mode<synchronous>, transform_indices = @transform_1, window_bounds = array<i64: 32, 32>}, {pipeline_mode = #tpu.pipeline_mode<synchronous>, transform_indices = @transform_2, window_bounds = array<i64: 1, 32>}, {pipeline_mode = #tpu.pipeline_mode<synchronous>, transform_indices = @transform_3, window_bounds = array<i64: 32, 1>}, {pipeline_mode = #tpu.pipeline_mode<synchronous>, transform_indices = @transform_4, window_bounds = array<i64: 1, 1>}, {pipeline_mode = #tpu.pipeline_mode<synchronous>, transform_indices = @transform_5, window_bounds = array<i64: 2, 1>}]} {
    %c0 = arith.constant 0 : index
    %c0_0 = arith.constant 0 : index
    %0 = vector.load %arg1[%c0, %c0_0] : memref<2x32xbf16, #tpu.memory_space<vmem>>, vector<2x32xbf16>
    %c0_1 = arith.constant 0 : index
    %c0_2 = arith.constant 0 : index
    %1 = vector.load %arg2[%c0_1, %c0_2] : memref<32x32xbf16, #tpu.memory_space<vmem>>, vector<32x32xbf16>
    %cst = arith.constant dense<0.000000e+00> : vector<2x32xf32>
    %2 = tpu.matmul %0, %1, %cst {dimension_numbers = #tpu.dot_dimension_numbers<[1], [0], [0], [1], [0, 0, 1, 1], [], []>} : vector<2x32xbf16>, vector<32x32xbf16>, vector<2x32xf32> -> vector<2x32xf32>
    %c0_3 = arith.constant 0 : index
    %c0_4 = arith.constant 0 : index
    %3 = vector.load %arg3[%c0_3, %c0_4] : memref<1x32xf32, #tpu.memory_space<vmem>>, vector<1x32xf32>
    %4 = vector.broadcast %3 : vector<1x32xf32> to vector<2x32xf32>
    %5 = arith.addf %2, %4 : vector<2x32xf32>
    %6 = math.tanh %5 : vector<2x32xf32>
    %cst_5 = arith.constant 0.000000e+00 : f32
    %7 = vector.broadcast %cst_5 : f32 to vector<2x32xf32>
    %8 = arith.maximumf %6, %7 : vector<2x32xf32>
    %9 = arith.truncf %8 : vector<2x32xf32> to vector<2x32xbf16>
    %c0_6 = arith.constant 0 : index
    %c0_7 = arith.constant 0 : index
    %10 = vector.load %arg4[%c0_6, %c0_7] : memref<32x1xbf16, #tpu.memory_space<vmem>>, vector<32x1xbf16>
    %cst_8 = arith.constant dense<0.000000e+00> : vector<2x1xf32>
    %11 = tpu.matmul %9, %10, %cst_8 {dimension_numbers = #tpu.dot_dimension_numbers<[1], [0], [0], [1], [0, 0, 1, 1], [], []>} : vector<2x32xbf16>, vector<32x1xbf16>, vector<2x1xf32> -> vector<2x1xf32>
    %c0_9 = arith.constant 0 : index
    %c0_10 = arith.constant 0 : index
    %12 = vector.load %arg5[%c0_9, %c0_10] : memref<1x1xf32, #tpu.memory_space<vmem>>, vector<1x1xf32>
    %13 = vector.broadcast %12 : vector<1x1xf32> to vector<2x1xf32>
    %14 = arith.addf %11, %13 : vector<2x1xf32>
    %c0_11 = arith.constant 0 : index
    %c0_12 = arith.constant 0 : index
    %15 = vector.load %arg6[%c0_11, %c0_12] : memref<2x1xf32, #tpu.memory_space<vmem>>, vector<2x1xf32>
    tpu.vector_store %arg6[%c0_11, %c0_12], %14 {strides = array<i32>} : memref<2x1xf32, #tpu.memory_space<vmem>>, vector<2x1xf32>,
    return
  }
  func.func @transform_0(%arg0: i32) -> (i32, i32) {
    %c0_i32 = arith.constant 0 : i32
    %c0_i32_0 = arith.constant 0 : i32
    %c0_i32_1 = arith.constant 0 : i32
    return %c0_i32, %c0_i32_0 : i32, i32
  }
  func.func @transform_1(%arg0: i32) -> (i32, i32) {
    %c0_i32 = arith.constant 0 : i32
    %c0_i32_0 = arith.constant 0 : i32
    %c0_i32_1 = arith.constant 0 : i32
    return %c0_i32, %c0_i32_0 : i32, i32
  }
  func.func @transform_2(%arg0: i32) -> (i32, i32) {
    %c0_i32 = arith.constant 0 : i32
    %c0_i32_0 = arith.constant 0 : i32
    %c0_i32_1 = arith.constant 0 : i32
    return %c0_i32, %c0_i32_0 : i32, i32
  }
  func.func @transform_3(%arg0: i32) -> (i32, i32) {
    %c0_i32 = arith.constant 0 : i32
    %c0_i32_0 = arith.constant 0 : i32
    %c0_i32_1 = arith.constant 0 : i32
    return %c0_i32, %c0_i32_0 : i32, i32
  }
  func.func @transform_4(%arg0: i32) -> (i32, i32) {
    %c0_i32 = arith.constant 0 : i32
    %c0_i32_0 = arith.constant 0 : i32
    %c0_i32_1 = arith.constant 0 : i32
    return %c0_i32, %c0_i32_0 : i32, i32
  }
  func.func @transform_5(%arg0: i32) -> (i32, i32) {
    %c0_i32 = arith.constant 0 : i32
    %c0_i32_0 = arith.constant 0 : i32
    %c0_i32_1 = arith.constant 0 : i32
    return %c0_i32, %c0_i32_0 : i32, i32
  }
}

</mosaic_0001>

<bundles_post_ra>
// kernel: codebert_forward.19
= control target key start
LH: loop header
LB: loop body
LE: loop exit
PB: predicated region body
PF: predicated region fallthrough
CT: control target
= control target key end

     0   :  { %vm19_vm0 = vcmask 261120   ;;  %v150_v0 = vmov 0.0   ;;  %vm151_vm1 = vmmov 0   ;;  %vm118_vm2 = vcmask 257024   ;;  %s195_s1 = inlined_call_operand.vmem [shape: bf16[32,32], index: 1, kind: input, shape index: {}]   ;;  %s196_s0 = inlined_call_operand.vmem [shape: bf16[16,32], index: 0, kind: input, shape index: {}]   ;;  %s197_s2 = inlined_call_operand.vmem [shape: f32[1,32], index: 2, kind: input, shape index: {}]   ;;  %s198_s3 = inlined_call_operand.vmem [shape: bf16[16,32], index: 3, kind: output, shape index: {}]  }
   0x1   :  { %137 = vmatprep.subr.bf16.mxu0 %v150_v0  ;;  %v147_v1 = vld [vmem:[%s195_s1 + $0x8] sm:$0xff]   ;;  %141 = vmatprep.mubr.msk.bf16.mxu0 %vm151_vm1, %v150_v0  ;;  %20 = vst.msk [vmem:[#allocation2] sm:$0xff] %vm19_vm0, %v150_v0  ;;  %21 = vst.msk [vmem:[#allocation2 + $0x8] sm:$0xff] %vm19_vm0, %v150_v0  ;;  %v148_v2 = vld [vmem:[%s195_s1] sm:$0xff]  }
   0x2   :  { %138 = vmatpush3.bf16.msra.mxu0 %v147_v1  ;;  %v149_v3 = vld [vmem:[%s196_s0] sm:$0xff]  }
   0x3   :  { %139 = vmatprep.subr.bf16.mxu0 %v150_v0  ;;  %v129_v12 = vld [vmem:[%s197_s2] ss:$0 sm:$0xff] }
   0x6   :  { %140 = vmatpush3.bf16.msra.mxu0 %v148_v2 }
   0x8   :  { %v22_v4 = vld [vmem:[#allocation2] sm:$0xff]  ;;  %v23_v8 = vld [vmem:[#allocation2 + $0x8] sm:$0xff] }
   0x9   :  { %142 = vmatmul.mubr.msk.bf16.vlgmr.msra.gmra.mxu0 %vm19_vm0, %v149_v3 }
  0xc9   :  { %v85_v5 = vpop.f32.mrf.mxu0 }
  0xca   :  { %v92_v6 = vadd.f32 %v85_v5, %v22_v4 }
  0xcb   :  { %v143_v7 = vpop.f32.mrf.mxu0 }
  0xcc   :  { %94 = vst.msk [vmem:[#allocation2] sm:$0xff] %vm19_vm0, %v92_v6 }
  0xcd   :  { %v88_v9 = vpop.f32.mrf.mxu0 }
  0xce   :  { %v93_v10 = vadd.f32 %v88_v9, %v23_v8 }
  0xcf   :  { %v144_v11 = vpop.f32.mrf.mxu0 }
  0xd0   :  { %95 = vst.msk [vmem:[#allocation2 + $0x8] sm:$0xff] %vm19_vm0, %v93_v10 }
  0xd3   :  { %v99_v13 = vld [vmem:[#allocation2] sm:$0xff] }
  0xd4   :  { %v108_v14 = vadd.f32 %v129_v12, %v99_v13 }
  0xd6   :  { %v132_v15 = vpack.c.bf16 %v108_v14, %v108_v14 }
  0xd7   :  { %v100_v16 = vld [vmem:[#allocation2 + $0x8] sm:$0xff] }
  0xd8   :  { %119 = vst.msk [vmem:[%s198_s3] sm:$0xf] %vm118_vm2, %v132_v15  ;;  %v109_v17 = vadd.f32 %v129_v12, %v100_v16 }
  0xda   :  { %v133_v18 = vpack.c.bf16 %v109_v17, %v109_v17 }
  0xdc   :  { %120 = vst.msk [vmem:[%s198_s3 + $0x4] sm:$0xf] %vm118_vm2, %v133_v18 }

// kernel: codebert_forward.16
= control target key start
LH: loop header
LB: loop body
LE: loop exit
PB: predicated region body
PF: predicated region fallthrough
CT: control target
= control target key end

     0   :  { %vm18_vm0 = vcmask 261120   ;;  %vm70_vm1 = vcmask 257024   ;;  %s129_s0 = inlined_call_operand.vmem [shape: f32[16,32], index: 0, kind: input, shape index: {}]   ;;  %s130_s1 = inlined_call_operand.vmem [shape: f32[1,32], index: 1, kind: input, shape index: {}]   ;;  %s131_s2 = inlined_call_operand.vmem [shape: f32[1,32], index: 2, kind: input, shape index: {}]   ;;  %s132_s3 = inlined_call_operand.vmem [shape: bf16[16,32], index: 3, kind: output, shape index: {}]  }
   0x1   :  { %v14_v0 = vld [vmem:[%s129_s0] sm:$0xff]  ;;  %v15_v1 = vld [vmem:[%s129_s0 + $0x8] sm:$0xff] }
   0x2   :  { %v19_v2 = vsel %vm18_vm0, %v14_v0, 0.0  ;;  %v22_v3 = vsel %vm18_vm0, %v15_v1, 0.0  ;;  %v77_v21 = vld [vmem:[%s130_s1] ss:$0 sm:$0xff] }
   0x3   :  { %20 = vadd.xlane.f32.xlu0 %v19_v2  ;;  %v78_v23 = vld [vmem:[%s131_s2] ss:$0 sm:$0xff] }
   0x7   :  { %23 = vadd.xlane.f32.xlu0 %v22_v3 }
  0x8c   :  { %v21_v4 = vpop.xlane.xlu0 %20 }
  0x8d   :  { %v26_v5 = vmul.f32 0.03125, %v21_v4 }
  0x8f   :  { %v28_v6 = vsub.f32 %v14_v0, %v26_v5 }
  0x90   :  { %v24_v7 = vpop.xlane.xlu0 %23 }
  0x91   :  { %v27_v8 = vmul.f32 0.03125, %v24_v7  ;;  %v30_v9 = vmul.f32 %v28_v6, %v28_v6 }
  0x93   :  { %v29_v10 = vsub.f32 %v15_v1, %v27_v8  ;;  %v32_v11 = vsel %vm18_vm0, %v30_v9, 0.0 }
  0x94   :  { %33 = vadd.xlane.f32.xlu1 %v32_v11 }
  0x95   :  { %v31_v12 = vmul.f32 %v29_v10, %v29_v10 }
  0x97   :  { %v35_v13 = vsel %vm18_vm0, %v31_v12, 0.0 }
  0x98   :  { %36 = vadd.xlane.f32.xlu1 %v35_v13 }
 0x11d   :  { %v34_v14 = vpop.xlane.xlu1 %33 }
 0x11e   :  { %v38_v15 = vmul.f32 0.03125, %v34_v14 }
 0x120   :  { %v40_v16 = vadd.f32 1e-05, %v38_v15 }
 0x121   :  { %v37_v17 = vpop.xlane.xlu1 %36 }
 0x122   :  { %83 = vrsqrt.f32 %v40_v16  ;;  %v39_v18 = vmul.f32 0.03125, %v37_v17 }
 0x124   :  { %v41_v19 = vadd.f32 1e-05, %v39_v18 }
 0x126   :  { %85 = vrsqrt.f32 %v41_v19 }
 0x12f   :  { %v84_v20 = vpop.eup %83 }
 0x130   :  { %v44_v22 = vmul.f32 %v84_v20, %v28_v6 }
 0x132   :  { %v52_v24 = vmul.f32 %v77_v21, %v44_v22 }
 0x133   :  { %v86_v25 = vpop.eup %85 }
 0x134   :  { %v60_v26 = vadd.f32 %v78_v23, %v52_v24  ;;  %v45_v27 = vmul.f32 %v86_v25, %v29_v10 }
 0x136   :  { %v81_v28 = vpack.c.bf16 %v60_v26, %v60_v26  ;;  %v53_v29 = vmul.f32 %v77_v21, %v45_v27 }
 0x138   :  { %71 = vst.msk [vmem:[%s132_s3] sm:$0xf] %vm70_vm1, %v81_v28  ;;  %v61_v30 = vadd.f32 %v78_v23, %v53_v29 }
 0x13a   :  { %v82_v31 = vpack.c.bf16 %v61_v30, %v61_v30 }
 0x13c   :  { %72 = vst.msk [vmem:[%s132_s3 + $0x4] sm:$0xf] %vm70_vm1, %v82_v31 }

// kernel: codebert_forward.17
= control target key start
LH: loop header
LB: loop body
LE: loop exit
PB: predicated region body
PF: predicated region fallthrough
CT: control target
= control target key end

     0   :  { %vm19_vm0 = vcmask 785408   ;;  %v151_v0 = vmov 0.0   ;;  %vm152_vm1 = vmmov 0   ;;  %vm47_vm2 = vcmask 261120   ;;  %s195_s1 = inlined_call_operand.vmem [shape: bf16[32,96], index: 1, kind: input, shape index: {}]   ;;  %s196_s0 = inlined_call_operand.vmem [shape: bf16[16,32], index: 0, kind: input, shape index: {}]   ;;  %s197_s2 = inlined_call_operand.vmem [shape: f32[1,96], index: 2, kind: input, shape index: {}]   ;;  %s198_s3 = inlined_call_operand.vmem [shape: bf16[16,96], index: 3, kind: output, shape index: {}]  }
   0x1   :  { %138 = vmatprep.subr.bf16.mxu0 %v151_v0  ;;  %v148_v1 = vld [vmem:[%s195_s1 + $0x8] sm:$0xff]   ;;  %142 = vmatprep.mubr.msk.bf16.mxu0 %vm152_vm1, %v151_v0  ;;  %20 = vst.msk [vmem:[#allocation2] sm:$0xff] %vm19_vm0, %v151_v0  ;;  %21 = vst.msk [vmem:[#allocation2 + $0x8] sm:$0xff] %vm19_vm0, %v151_v0  ;;  %v149_v2 = vld [vmem:[%s195_s1] sm:$0xff]   ;;  %vm119_vm3 = vcmask 781312  }
   0x2   :  { %139 = vmatpush3.bf16.msra.mxu0 %v148_v1  ;;  %v150_v3 = vld [vmem:[%s196_s0] sm:$0xff]  }
   0x3   :  { %140 = vmatprep.subr.bf16.mxu0 %v151_v0  ;;  %v130_v12 = vld [vmem:[%s197_s2] ss:$0 sm:$0xff] }
   0x6   :  { %141 = vmatpush3.bf16.msra.mxu0 %v149_v2 }
   0x8   :  { %v22_v4 = vld [vmem:[#allocation2] sm:$0xff]  ;;  %v23_v8 = vld [vmem:[#allocation2 + $0x8] sm:$0xff] }
   0x9   :  { %143 = vmatmul.mubr.msk.bf16.vlgmr.msra.gmra.mxu0 %vm47_vm2, %v150_v3 }
  0xc9   :  { %v85_v5 = vpop.f32.mrf.mxu0 }
  0xca   :  { %v92_v6 = vadd.f32 %v85_v5, %v22_v4 }
  0xcb   :  { %v144_v7 = vpop.f32.mrf.mxu0 }
  0xcc   :  { %95 = vst.msk [vmem:[#allocation2] sm:$0xff] %vm19_vm0, %v92_v6 }
  0xcd   :  { %v88_v9 = vpop.f32.mrf.mxu0 }
  0xce   :  { %v93_v10 = vadd.f32 %v88_v9, %v23_v8 }
  0xcf   :  { %v145_v11 = vpop.f32.mrf.mxu0 }
  0xd0   :  { %96 = vst.msk [vmem:[#allocation2 + $0x8] sm:$0xff] %vm19_vm0, %v93_v10 }
  0xd3   :  { %v100_v13 = vld [vmem:[#allocation2] sm:$0xff] }
  0xd4   :  { %v109_v14 = vadd.f32 %v130_v12, %v100_v13 }
  0xd6   :  { %v133_v15 = vpack.c.bf16 %v109_v14, %v109_v14 }
  0xd7   :  { %v101_v16 = vld [vmem:[#allocation2 + $0x8] sm:$0xff] }
  0xd8   :  { %120 = vst.msk [vmem:[%s198_s3] sm:$0xf] %vm119_vm3, %v133_v15  ;;  %v110_v17 = vadd.f32 %v130_v12, %v101_v16 }
  0xda   :  { %v134_v18 = vpack.c.bf16 %v110_v17, %v110_v17 }
  0xdc   :  { %121 = vst.msk [vmem:[%s198_s3 + $0x4] sm:$0xf] %vm119_vm3, %v134_v18 }

// kernel: codebert_forward.18
= control target key start
LH: loop header
LB: loop body
LE: loop exit
PB: predicated region body
PF: predicated region fallthrough
CT: control target
= control target key end

     0   :  { %s1001_s12 = smov 0   ;;  %s1003_s13 = smov 0   ;;  %s1113_s0 = inlined_call_operand.vmem [shape: bf16[2,8,96], index: 0, kind: input, shape index: {}, may-alias: {0,1}]   ;;  %s1114_s1 = inlined_call_operand.vmem [shape: bf16[2,8,96], index: 1, kind: input, shape index: {}, may-alias: {0,1}]   ;;  %s1115_s2 = inlined_call_operand.vmem [shape: f32[2,1,8], index: 2, kind: input, shape index: {}]   ;;  %s1116_s3 = inlined_call_operand.vmem [shape: bf16[2,8,32], index: 3, kind: output, shape index: {}]  }
   0x1   :  { %s1005_s14 = smov 0  }
   0x2 LB: > { %s25_s15 = sadd.s32 1, %s959_s13  ;;  %p804_p0 = scmp.ge.s32.totalorder %s963_s14, 1  ;;  %s963_s14 = sphi %s1005_s14, %s13_s14   ;;  %s959_s13 = sphi %s1003_s13, %s1118_s13   ;;  %s955_s12 = sphi %s1001_s12, %s1117_s12  }
   0x3   : > { %p27_p1 = scmp.ge.s32.totalorder %s25_s15, 2  ;;  %p172_p2 = scmp.lt.s32.totalorder %s963_s14, 3 }
   0x5   : > { %s1120_s15 = smov (%p27_p1, %s25_s15), 0  ;;  %p173_p3 = pnand %p804_p0, %p172_p2 }
   0x6   : > { %p207_p4 = scmp.lt.s32.totalorder (!%p173_p3), %s955_s12, 1  ;;  %s967_s20 = smov (!%p173_p3), 96  }
   0x7   : > { %176 = sbr.rel (%p173_p3) target bundleno = 1538 (0x602), region = 32  ;;  %s968_s24 = smov (!%p173_p3), 64  }
   0x8   : > { %s969_s25 = smov (!%p173_p3), 88   ;;  %s970_s29 = smov (!%p173_p3), 72  }
   0x9   : > { %s971_s30 = smov (!%p173_p3), 120   ;;  %s972_s4 = smov (!%p173_p3), 80  }
   0xa   : > { %s973_s5 = smov (!%p173_p3), 112   ;;  %s974_s6 = smov (!%p173_p3), 104  }
   0xb   : > { %s975_s7 = smov (!%p173_p3), 56   ;;  %s976_s8 = smov (!%p173_p3), 48  }
   0xc   : > { %v965_v0 = vmov 0.0   ;;  %vm966_vm0 = vmmov 0   ;;  %s1122_s12 = smov (!%p207_p4, %s955_s12), 1  ;;  %vm246_vm1 = vcmask 64512   ;;  %vm310_vm2 = vcmask 1043456   ;;  %s977_s9 = smov 40  }
   0xd   : > { %836 = vmatprep.subr.bf16.mxu0 %v965_v0  ;;  %838 = vmatprep.mubr.msk.bf16.mxu0 %vm966_vm0, %v965_v0  ;;  %s1025_s16 = sshll.u32 %s1122_s12, 2  ;;  %s220_s28 = scalar_lea.vmem %s1115_s2, %s1122_s12  ;;  %vm698_vm3 = vcmask 130048   ;;  %vm700_vm4 = vcmask 195584   ;;  %vm703_vm5 = vcmask 257024  }
   0xe   : > { %842 = vmatprep.subr.bf16.mxu1 %v965_v0  ;;  %844 = vmatprep.mubr.msk.bf16.mxu1 %vm966_vm0, %v965_v0  ;;  %s217_s19 = scalar_lea.vmem %s1114_s1, %s1025_s16  ;;  %s213_s23 = scalar_lea.vmem %s1113_s0, %s1025_s16  ;;  %v1048_v8 = vld [vmem:[%s220_s28] ss:$0 sm:$0xff] }
   0xf   : > { %v1031_v1 = vld [vmem:[%s217_s19] ss:$0 sps:$4 sm:$0xff]   ;;  %s978_s10 = smov 8   ;;  %s979_s11 = smov 16  }
  0x10   : > { %244 = vrot.lane.b32.xlu0 %v1031_v1, %s967_s20  ;;  %v229_v2 = vld [vmem:[%s213_s23] sm:$0xf]  ;;  %305 = vrot.lane.b32.xlu1 %v1031_v1, %s968_s24  ;;  %s980_s12 = smov 24   ;;  %s227_s19 = scalar_lea.vmem %s1116_s3, %s1025_s16 }
  0x11   : > { %v232_v3 = vunpack.c.l.bf16 %v229_v2 }
  0x13   : > { %v233_v6 = vmul.f32 0.35355338, %v232_v3 }
  0x14   : > { %357 = vrot.lane.b32.xlu1 %v1031_v1, %s969_s25 }
  0x15   : > { %v234_v7 = vpack.c.bf16 %v233_v6, %v233_v6 }
  0x82   : > { %v245_v4 = vpop.permute.xlu0 %244  ;;  %v306_v15 = vpop.permute.xlu1 %305 }
  0x83   : > { %v251_v5 = vsel %vm246_vm1, %v245_v4, 0  ;;  %v312_v16 = vsel %vm310_vm2, %v306_v15, 0 }
  0x84   : > { %837 = vmatpush3.bf16.xpose.msra.mxu0 %v251_v5  ;;  %843 = vmatpush3.bf16.msra.mxu1 %v312_v16 }
  0x85   : > { %854 = vmatprep.subr.bf16.mxu0 %v965_v0  ;;  %848 = vmatprep.subr.bf16.mxu1 %v965_v0 }
  0x86   : > { %v358_v22 = vpop.permute.xlu1 %357 }
  0x87   : > { %v363_v28 = vsel %vm246_vm1, %v358_v22, 0 }
  0x8b   : > { %839 = vmatmul.mubr.msk.bf16.vlgmr.msra.gmra.mxu0 %vm246_vm1, %v234_v7 }
  0x8c   : > { %856 = vmatprep.mubr.msk.bf16.mxu0 %vm966_vm0, %v965_v0 }
 0x14b   : > { %v287_v9 = vpop.f32.mrf.mxu0 }
 0x14c   : > { %v288_v10 = vadd.f32 %v1048_v8, %v287_v9 }
 0x14d   : > { %v840_v11 = vpop.f32.mrf.mxu0 }
 0x14e   : > { %v293_v12 = vsel %vm246_vm1, %v288_v10, -inf }
 0x14f   : > { %294 = vmax.xlane.f32.xlu0 %v293_v12  ;;  %v290_v13 = vpop.f32.mrf.mxu0 }
 0x151   : > { %v841_v14 = vpop.f32.mrf.mxu0 }
 0x165   : > { %577 = vrot.lane.b32.xlu0 %v1031_v1, %s970_s29 }
 0x1d8   : > { %v295_v17 = vpop.xlane.xlu0 %294 }
 0x1d9   : > { %v296_v18 = vsub.f32 %v288_v10, %v295_v17 }
 0x1db   : > { %v297_v19 = vmul.f32 1.442695, %v296_v18 }
 0x1dc   : > { %v578_v31 = vpop.permute.xlu0 %577 }
 0x1dd   : > { %925 = vpow2.f32 %v297_v19  ;;  %v583_v33 = vsel %vm246_vm1, %v578_v31, 0 }
 0x1ea   : > { %v926_v20 = vpop.eup %925 }
 0x1eb   : > { %v299_v21 = vsel %vm246_vm1, %v926_v20, 0.0 }
 0x1ec   : > { %300 = vadd.xlane.f32.xlu1 %v299_v21 }
 0x1fd   : > { %355 = vrot.lane.b32.xlu1 %v234_v7, %s971_s30 }
 0x201   : > { %467 = vrot.lane.b32.xlu1 %v1031_v1, %s972_s4 }
 0x205   : > { %465 = vrot.lane.b32.xlu1 %v234_v7, %s973_s5 }
 0x209   : > { %575 = vrot.lane.b32.xlu1 %v234_v7, %s974_s6 }
 0x275   : > { %v301_v23 = vpop.xlane.xlu1 %300 }
 0x276   : > { %927 = vrcp.f32 %v301_v23 }
 0x279   : > { %v356_v26 = vpop.permute.xlu1 %355 }
 0x27d   : > { %v468_v29 = vpop.permute.xlu1 %467 }
 0x27e   : > { %v473_v30 = vsel %vm246_vm1, %v468_v29, 0 }
 0x281   : > { %v466_v32 = vpop.permute.xlu1 %465 }
 0x283   : > { %v928_v24 = vpop.eup %927 }
 0x284   : > { %v303_v25 = vmul.f32 %v928_v24, %v926_v20 }
 0x285   : > { %v576_v34 = vpop.permute.xlu1 %575 }
 0x286   : > { %v304_v27 = vpack.c.bf16 %v303_v25, %v303_v25 }
 0x288   : > { %845 = vmatmul.mubr.msk.bf16.vlgmr.msra.gmra.mxu1 %vm246_vm1, %v304_v27 }
 0x289   : > { %849 = vmatpush3.bf16.xpose.msra.mxu1 %v363_v28  ;;  %850 = vmatprep.mubr.msk.bf16.mxu1 %vm966_vm0, %v965_v0 }
 0x28a   : > { %860 = vmatprep.subr.bf16.mxu1 %v965_v0 }
 0x290   : > { %851 = vmatmul.mubr.msk.bf16.vlgmr.msra.gmra.mxu1 %vm246_vm1, %v356_v26 }
 0x291   : > { %861 = vmatpush3.bf16.xpose.msra.mxu1 %v473_v30  ;;  %862 = vmatprep.mubr.msk.bf16.mxu1 %vm966_vm0, %v965_v0 }
 0x292   : > { %872 = vmatprep.subr.bf16.mxu1 %v965_v0 }
 0x298   : > { %863 = vmatmul.mubr.msk.bf16.vlgmr.msra.gmra.mxu1 %vm246_vm1, %v466_v32 }
 0x299   : > { %873 = vmatpush3.bf16.xpose.msra.mxu1 %v583_v33  ;;  %874 = vmatprep.mubr.msk.bf16.mxu1 %vm966_vm0, %v965_v0 }
 0x2a0   : > { %875 = vmatmul.mubr.msk.bf16.vlgmr.msra.gmra.mxu1 %vm246_vm1, %v576_v34 }
 0x348   : > { %v1072_v35 = vpop.f32.mrf.mxu1 }
 0x34a   : > { %v846_v36 = vpop.f32.mrf.mxu1 }
 0x34c   : > { %v351_v37 = vpop.f32.mrf.mxu1 }
 0x34e   : > { %v847_v38 = vpop.f32.mrf.mxu1 }
 0x350   : > { %v399_v39 = vpop.f32.mrf.mxu1 }
 0x351   : > { %v400_v40 = vadd.f32 %v1048_v8, %v399_v39 }
 0x352   : > { %v852_v41 = vpop.f32.mrf.mxu1 }
 0x353   : > { %v405_v42 = vsel %vm246_vm1, %v400_v40, -inf }
 0x354   : > { %406 = vmax.xlane.f32.xlu1 %v405_v42  ;;  %v402_v43 = vpop.f32.mrf.mxu1 }
 0x356   : > { %v853_v44 = vpop.f32.mrf.mxu1 }
 0x358   : > { %v509_v45 = vpop.f32.mrf.mxu1 }
 0x359   : > { %v510_v46 = vadd.f32 %v1048_v8, %v509_v45 }
 0x35a   : > { %v864_v47 = vpop.f32.mrf.mxu1 }
 0x35b   : > { %v515_v48 = vsel %vm246_vm1, %v510_v46, -inf }
 0x35c   : > { %516 = vmax.xlane.f32.xlu0 %v515_v48  ;;  %v512_v49 = vpop.f32.mrf.mxu1 }
 0x35e   : > { %v865_v50 = vpop.f32.mrf.mxu1 }
 0x360   : > { %v619_v51 = vpop.f32.mrf.mxu1 }
 0x361   : > { %v620_v52 = vadd.f32 %v1048_v8, %v619_v51 }
 0x362   : > { %v876_v53 = vpop.f32.mrf.mxu1 }
 0x363   : > { %v625_v54 = vsel %vm246_vm1, %v620_v52, -inf }
 0x364   : > { %626 = vmax.xlane.f32.xlu1 %v625_v54  ;;  %v622_v55 = vpop.f32.mrf.mxu1 }
 0x366   : > { %v877_v56 = vpop.f32.mrf.mxu1 }
 0x3dd   : > { %v407_v57 = vpop.xlane.xlu1 %406 }
 0x3de   : > { %v408_v58 = vsub.f32 %v400_v40, %v407_v57 }
 0x3e0   : > { %v409_v59 = vmul.f32 1.442695, %v408_v58 }
 0x3e2   : > { %929 = vpow2.f32 %v409_v59 }
 0x3e5   : > { %v517_v5 = vpop.xlane.xlu0 %516 }
 0x3e6   : > { %v518_v6 = vsub.f32 %v510_v46, %v517_v5 }
 0x3e8   : > { %v519_v7 = vmul.f32 1.442695, %v518_v6 }
 0x3ed   : > { %v627_v60 = vpop.xlane.xlu1 %626 }
 0x3ee   : > { %v628_v61 = vsub.f32 %v620_v52, %v627_v60 }
 0x3ef   : > { %v930_v62 = vpop.eup %929 }
 0x3f0   : > { %v629_v63 = vmul.f32 1.442695, %v628_v61  ;;  %v411_v2 = vsel %vm246_vm1, %v930_v62, 0.0 }
 0x3f1   : > { %412 = vadd.xlane.f32.xlu1 %v411_v2 }
 0x3f2   : > { %931 = vpow2.f32 %v629_v63 }
 0x3f3   : > { %933 = vpow2.f32 %v519_v7 }
 0x3ff   : > { %v932_v3 = vpop.eup %931 }
 0x400   : > { %v631_v4 = vsel %vm246_vm1, %v932_v3, 0.0  ;;  %v934_v8 = vpop.eup %933 }
 0x401   : > { %632 = vadd.xlane.f32.xlu0 %v631_v4  ;;  %v521_v9 = vsel %vm246_vm1, %v934_v8, 0.0 }
 0x402   : > { %417 = vrot.lane.b32.xlu1 %v1031_v1, %s975_s7 }
 0x417   : > { %527 = vrot.lane.b32.xlu0 %v1031_v1, %s976_s8 }
 0x426   : > { %522 = vadd.xlane.f32.xlu1 %v521_v9 }
 0x437   : > { %637 = vrot.lane.b32.xlu1 %v1031_v1, %s977_s9 }
 0x47a   : > { %v413_v10 = vpop.xlane.xlu1 %412 }
 0x47b   : > { %935 = vrcp.f32 %v413_v10 }
 0x47e   : > { %v418_v11 = vpop.permute.xlu1 %417 }
 0x47f   : > { %v423_v12 = vsel %vm310_vm2, %v418_v11, 0 }
 0x480   : > { %855 = vmatpush3.bf16.msra.mxu0 %v423_v12 }
 0x481   : > { %866 = vmatprep.subr.bf16.mxu0 %v965_v0 }
 0x488   : > { %v936_v13 = vpop.eup %935 }
 0x489   : > { %v415_v14 = vmul.f32 %v936_v13, %v930_v62 }
 0x48a   : > { %v633_v15 = vpop.xlane.xlu0 %632 }
 0x48b   : > { %v416_v16 = vpack.c.bf16 %v415_v14, %v415_v14 }
 0x48d   : > { %857 = vmatmul.mubr.msk.bf16.vlgmr.msra.gmra.mxu0 %vm246_vm1, %v416_v16 }
 0x48e   : > { %v528_v17 = vpop.permute.xlu0 %527  ;;  %868 = vmatprep.mubr.msk.bf16.mxu0 %vm966_vm0, %v965_v0 }
 0x48f   : > { %v533_v1 = vsel %vm310_vm2, %v528_v17, 0 }
 0x490   : > { %867 = vmatpush3.bf16.msra.mxu0 %v533_v1 }
 0x491   : > { %878 = vmatprep.subr.bf16.mxu0 %v965_v0 }
 0x4af   : > { %v523_v18 = vpop.xlane.xlu1 %522 }
 0x4b0   : > { %937 = vrcp.f32 %v523_v18 }
 0x4b1   : > { %939 = vrcp.f32 %v633_v15 }
 0x4b3   : > { %v638_v20 = vpop.permute.xlu1 %637 }
 0x4b4   : > { %v643_v22 = vsel %vm310_vm2, %v638_v20, 0 }
 0x4bd   : > { %v938_v19 = vpop.eup %937 }
 0x4be   : > { %v525_v21 = vmul.f32 %v938_v19, %v934_v8  ;;  %v940_v24 = vpop.eup %939 }
 0x4bf   : > { %v635_v25 = vmul.f32 %v940_v24, %v932_v3 }
 0x4c0   : > { %v526_v23 = vpack.c.bf16 %v525_v21, %v525_v21 }
 0x4c1   : > { %v636_v26 = vpack.c.bf16 %v635_v25, %v635_v25 }
 0x4c2   : > { %869 = vmatmul.mubr.msk.bf16.vlgmr.msra.gmra.mxu0 %vm246_vm1, %v526_v23 }
 0x4c3   : > { %879 = vmatpush3.bf16.msra.mxu0 %v643_v22  ;;  %880 = vmatprep.mubr.msk.bf16.mxu0 %vm966_vm0, %v965_v0 }
 0x4ca   : > { %881 = vmatmul.mubr.msk.bf16.vlgmr.msra.gmra.mxu0 %vm246_vm1, %v636_v26 }
 0x54d   : > { %v459_v27 = vpop.f32.mrf.mxu0 }
 0x54e   : > { %686 = vrot.lane.b32.xlu1 %v459_v27, %s978_s10 }
 0x54f   : > { %v858_v28 = vpop.f32.mrf.mxu0 }
 0x551   : > { %v462_v29 = vpop.f32.mrf.mxu0 }
 0x553   : > { %v859_v30 = vpop.f32.mrf.mxu0 }
 0x582   : > { %v569_v31 = vpop.f32.mrf.mxu0 }
 0x583   : > { %690 = vrot.lane.b32.xlu0 %v569_v31, %s979_s11 }
 0x584   : > { %v870_v32 = vpop.f32.mrf.mxu0 }
 0x586   : > { %v572_v33 = vpop.f32.mrf.mxu0 }
 0x588   : > { %v871_v34 = vpop.f32.mrf.mxu0 }
 0x58a   : > { %v679_v36 = vpop.f32.mrf.mxu0 }
 0x58b   : > { %694 = vrot.lane.b32.xlu1 %v679_v36, %s980_s12 }
 0x58c   : > { %v882_v0 = vpop.f32.mrf.mxu0 }
 0x58e   : > { %v682_v37 = vpop.f32.mrf.mxu0 }
 0x590   : > { %v883_v38 = vpop.f32.mrf.mxu0 }
 0x5c0   : > { %v687_v39 = vpop.permute.xlu1 %686 }
 0x5c1   : > { %v697_v41 = vsel %vm246_vm1, %v1072_v35, %v687_v39 }
 0x5f5   : > { %v691_v40 = vpop.permute.xlu0 %690 }
 0x5f6   : > { %v699_v42 = vsel %vm698_vm3, %v697_v41, %v691_v40 }
 0x5fd   : > { %v695_v43 = vpop.permute.xlu1 %694 }
 0x5fe   : > { %v701_v44 = vsel %vm700_vm4, %v699_v42, %v695_v43 }
 0x5ff   : > { %v702_v45 = vpack.c.bf16 %v701_v44, %v701_v44 }
 0x601   : > { %704 = vst.msk [vmem:[%s227_s19] sm:$0xf] %vm703_vm5, %v702_v45 }
 0x602 PF: > { %s13_s14 = sadd.s32 1, %s963_s14   ;;  %s1117_s12 = smov %s959_s13 }
 0x603   : > { %p10_p5 = scmp.ge.s32.totalorder %s13_s14, 4   ;;  %s1118_s13 = smov %s1120_s15 }
 0x605   :  { %12 = sbr.rel (!%p10_p5) target bundleno = 2 (0x2), region = 68 }

// kernel: codebert_forward.20
= control target key start
LH: loop header
LB: loop body
LE: loop exit
PB: predicated region body
PF: predicated region fallthrough
CT: control target
= control target key end

     0   :  { %vm29_vm0 = vcmask 261120   ;;  %vm81_vm1 = vcmask 257024   ;;  %s153_s0 = inlined_call_operand.vmem [shape: bf16[16,32], index: 0, kind: input, shape index: {}]   ;;  %s154_s1 = inlined_call_operand.vmem [shape: bf16[16,32], index: 1, kind: input, shape index: {}]   ;;  %s155_s2 = inlined_call_operand.vmem [shape: f32[1,32], index: 2, kind: input, shape index: {}]   ;;  %s156_s3 = inlined_call_operand.vmem [shape: f32[1,32], index: 3, kind: input, shape index: {}]   ;;  %s157_s4 = inlined_call_operand.vmem [shape: bf16[16,32], index: 4, kind: output, shape index: {}]  }
   0x1   :  { %v95_v0 = vld [vmem:[%s153_s0] sm:$0xff]  }
   0x2   :  { %v99_v1 = vld [vmem:[%s154_s1] sm:$0xff]   ;;  %v96_v2 = vunpack.c.l.bf16 %v95_v0  ;;  %v97_v4 = vunpack.c.h.bf16 %v95_v0 }
   0x3   :  { %v100_v3 = vunpack.c.l.bf16 %v99_v1  ;;  %v101_v5 = vunpack.c.h.bf16 %v99_v1  ;;  %v88_v27 = vld [vmem:[%s155_s2] ss:$0 sm:$0xff] }
   0x4   :  { %v89_v29 = vld [vmem:[%s156_s3] ss:$0 sm:$0xff] }
   0x5   :  { %v25_v6 = vadd.f32 %v100_v3, %v96_v2  ;;  %v26_v7 = vadd.f32 %v101_v5, %v97_v4 }
   0x7   :  { %v30_v8 = vsel %vm29_vm0, %v25_v6, 0.0  ;;  %v33_v9 = vsel %vm29_vm0, %v26_v7, 0.0 }
   0x8   :  { %31 = vadd.xlane.f32.xlu0 %v30_v8 }
   0xc   :  { %34 = vadd.xlane.f32.xlu0 %v33_v9 }
  0x91   :  { %v32_v10 = vpop.xlane.xlu0 %31 }
  0x92   :  { %v37_v11 = vmul.f32 0.03125, %v32_v10 }
  0x94   :  { %v39_v12 = vsub.f32 %v25_v6, %v37_v11 }
  0x95   :  { %v35_v13 = vpop.xlane.xlu0 %34 }
  0x96   :  { %v38_v14 = vmul.f32 0.03125, %v35_v13  ;;  %v41_v15 = vmul.f32 %v39_v12, %v39_v12 }
  0x98   :  { %v40_v16 = vsub.f32 %v26_v7, %v38_v14  ;;  %v43_v17 = vsel %vm29_vm0, %v41_v15, 0.0 }
  0x99   :  { %44 = vadd.xlane.f32.xlu1 %v43_v17 }
  0x9a   :  { %v42_v18 = vmul.f32 %v40_v16, %v40_v16 }
  0x9c   :  { %v46_v19 = vsel %vm29_vm0, %v42_v18, 0.0 }
  0x9d   :  { %47 = vadd.xlane.f32.xlu1 %v46_v19 }
 0x122   :  { %v45_v20 = vpop.xlane.xlu1 %44 }
 0x123   :  { %v49_v21 = vmul.f32 0.03125, %v45_v20 }
 0x125   :  { %v51_v22 = vadd.f32 1e-05, %v49_v21 }
 0x126   :  { %v48_v23 = vpop.xlane.xlu1 %47 }
 0x127   :  { %102 = vrsqrt.f32 %v51_v22  ;;  %v50_v24 = vmul.f32 0.03125, %v48_v23 }
 0x129   :  { %v52_v25 = vadd.f32 1e-05, %v50_v24 }
 0x12b   :  { %104 = vrsqrt.f32 %v52_v25 }
 0x134   :  { %v103_v26 = vpop.eup %102 }
 0x135   :  { %v55_v28 = vmul.f32 %v103_v26, %v39_v12 }
 0x137   :  { %v63_v30 = vmul.f32 %v88_v27, %v55_v28 }
 0x138   :  { %v105_v31 = vpop.eup %104 }
 0x139   :  { %v71_v32 = vadd.f32 %v89_v29, %v63_v30  ;;  %v56_v33 = vmul.f32 %v105_v31, %v40_v16 }
 0x13b   :  { %v92_v34 = vpack.c.bf16 %v71_v32, %v71_v32  ;;  %v64_v35 = vmul.f32 %v88_v27, %v56_v33 }
 0x13d   :  { %82 = vst.msk [vmem:[%s157_s4] sm:$0xf] %vm81_vm1, %v92_v34  ;;  %v72_v36 = vadd.f32 %v89_v29, %v64_v35 }
 0x13f   :  { %v93_v37 = vpack.c.bf16 %v72_v36, %v72_v36 }
 0x141   :  { %83 = vst.msk [vmem:[%s157_s4 + $0x4] sm:$0xf] %vm81_vm1, %v93_v37 }

// kernel: codebert_forward.21
= control target key start
LH: loop header
LB: loop body
LE: loop exit
PB: predicated region body
PF: predicated region fallthrough
CT: control target
= control target key end

     0   :  { %vm19_vm0 = vcmask 523264   ;;  %v173_v0 = vmov 0.0   ;;  %vm174_vm1 = vmmov 0   ;;  %vm47_vm2 = vcmask 261120   ;;  %s217_s1 = inlined_call_operand.vmem [shape: bf16[32,64], index: 1, kind: input, shape index: {}]   ;;  %s218_s0 = inlined_call_operand.vmem [shape: bf16[16,32], index: 0, kind: input, shape index: {}]   ;;  %s219_s2 = inlined_call_operand.vmem [shape: f32[1,64], index: 2, kind: input, shape index: {}]   ;;  %s220_s3 = inlined_call_operand.vmem [shape: bf16[16,64], index: 3, kind: output, shape index: {}]  }
   0x1   :  { %156 = vmatprep.subr.bf16.mxu0 %v173_v0  ;;  %v166_v1 = vld [vmem:[%s217_s1 + $0x8] sm:$0xff]   ;;  %160 = vmatprep.mubr.msk.bf16.mxu0 %vm174_vm1, %v173_v0  ;;  %20 = vst.msk [vmem:[#allocation2] sm:$0xff] %vm19_vm0, %v173_v0  ;;  %21 = vst.msk [vmem:[#allocation2 + $0x8] sm:$0xff] %vm19_vm0, %v173_v0  ;;  %v167_v2 = vld [vmem:[%s217_s1] sm:$0xff]   ;;  %vm137_vm3 = vcmask 519168  }
   0x2   :  { %157 = vmatpush3.bf16.msra.mxu0 %v166_v1  ;;  %v168_v3 = vld [vmem:[%s218_s0] sm:$0xff]  }
   0x3   :  { %158 = vmatprep.subr.bf16.mxu0 %v173_v0  ;;  %v148_v12 = vld [vmem:[%s219_s2] ss:$0 sm:$0xff] }
   0x6   :  { %159 = vmatpush3.bf16.msra.mxu0 %v167_v2 }
   0x8   :  { %v22_v4 = vld [vmem:[#allocation2] sm:$0xff]  ;;  %v23_v8 = vld [vmem:[#allocation2 + $0x8] sm:$0xff] }
   0x9   :  { %161 = vmatmul.mubr.msk.bf16.vlgmr.msra.gmra.mxu0 %vm47_vm2, %v168_v3 }
  0xc9   :  { %v85_v5 = vpop.f32.mrf.mxu0 }
  0xca   :  { %v92_v6 = vadd.f32 %v85_v5, %v22_v4 }
  0xcb   :  { %v162_v7 = vpop.f32.mrf.mxu0 }
  0xcc   :  { %95 = vst.msk [vmem:[#allocation2] sm:$0xff] %vm19_vm0, %v92_v6 }
  0xcd   :  { %v88_v9 = vpop.f32.mrf.mxu0 }
  0xce   :  { %v93_v10 = vadd.f32 %v88_v9, %v23_v8 }
  0xcf   :  { %v163_v11 = vpop.f32.mrf.mxu0 }
  0xd0   :  { %96 = vst.msk [vmem:[#allocation2 + $0x8] sm:$0xff] %vm19_vm0, %v93_v10 }
  0xd3   :  { %v100_v13 = vld [vmem:[#allocation2] sm:$0xff] }
  0xd4   :  { %v109_v14 = vadd.f32 %v148_v12, %v100_v13 }
  0xd6   :  { %v111_v15 = vmul.f32 %v109_v14, %v109_v14 }
  0xd7   :  { %v101_v16 = vld [vmem:[#allocation2 + $0x8] sm:$0xff] }
  0xd8   :  { %v113_v17 = vmul.f32 %v111_v15, %v109_v14  ;;  %v110_v18 = vadd.f32 %v148_v12, %v101_v16 }
  0xda   :  { %v115_v19 = vmul.f32 0.044715, %v113_v17  ;;  %v112_v20 = vmul.f32 %v110_v18, %v110_v18 }
  0xdc   :  { %v117_v21 = vadd.f32 %v115_v19, %v109_v14  ;;  %v114_v22 = vmul.f32 %v112_v20, %v110_v18 }
  0xde   :  { %v119_v23 = vmul.f32 0.7978846, %v117_v21  ;;  %v116_v24 = vmul.f32 0.044715, %v114_v22 }
  0xe0   :  { %169 = vtanh.f32 %v119_v23  ;;  %v118_v25 = vadd.f32 %v116_v24, %v110_v18 }
  0xe2   :  { %v120_v26 = vmul.f32 0.7978846, %v118_v25 }
  0xe4   :  { %171 = vtanh.f32 %v120_v26 }
  0xed   :  { %v170_v27 = vpop.eup %169 }
  0xee   :  { %v123_v28 = vadd.f32 1.0, %v170_v27 }
  0xf0   :  { %v125_v29 = vmul.f32 0.5, %v123_v28 }
  0xf1   :  { %v172_v30 = vpop.eup %171 }
  0xf2   :  { %v127_v31 = vmul.f32 %v125_v29, %v109_v14  ;;  %v124_v32 = vadd.f32 1.0, %v172_v30 }
  0xf4   :  { %v151_v33 = vpack.c.bf16 %v127_v31, %v127_v31  ;;  %v126_v34 = vmul.f32 0.5, %v124_v32 }
  0xf6   :  { %138 = vst.msk [vmem:[%s220_s3] sm:$0xf] %vm137_vm3, %v151_v33  ;;  %v128_v35 = vmul.f32 %v126_v34, %v110_v18 }
  0xf8   :  { %v152_v36 = vpack.c.bf16 %v128_v35, %v128_v35 }
  0xfa   :  { %139 = vst.msk [vmem:[%s220_s3 + $0x4] sm:$0xf] %vm137_vm3, %v152_v36 }

// kernel: codebert_forward.22
= control target key start
LH: loop header
LB: loop body
LE: loop exit
PB: predicated region body
PF: predicated region fallthrough
CT: control target
= control target key end

     0   :  { %vm19_vm0 = vcmask 261120   ;;  %v177_v0 = vmov 0.0   ;;  %vm178_vm1 = vmmov 0   ;;  %vm63_vm2 = vcmask 523264   ;;  %s227_s1 = inlined_call_operand.vmem [shape: bf16[64,32], index: 1, kind: input, shape index: {}]   ;;  %s228_s0 = inlined_call_operand.vmem [shape: bf16[16,64], index: 0, kind: input, shape index: {}]   ;;  %s229_s2 = inlined_call_operand.vmem [shape: f32[1,32], index: 2, kind: input, shape index: {}]   ;;  %s230_s3 = inlined_call_operand.vmem [shape: bf16[16,32], index: 3, kind: output, shape index: {}]  }
   0x1   :  { %158 = vmatprep.subr.bf16.mxu0 %v177_v0  ;;  %v172_v1 = vld [vmem:[%s227_s1 + $0x18] sm:$0xff]   ;;  %166 = vmatprep.mubr.msk.bf16.mxu0 %vm178_vm1, %v177_v0  ;;  %20 = vst.msk [vmem:[#allocation2] sm:$0xff] %vm19_vm0, %v177_v0  ;;  %21 = vst.msk [vmem:[#allocation2 + $0x8] sm:$0xff] %vm19_vm0, %v177_v0  ;;  %v173_v2 = vld [vmem:[%s227_s1 + $0x10] sm:$0xff]   ;;  %vm135_vm3 = vcmask 257024  }
   0x2   :  { %159 = vmatpush3.bf16.msra.mxu0 %v172_v1  ;;  %v174_v3 = vld [vmem:[%s227_s1 + $0x8] sm:$0xff]   ;;  %v175_v4 = vld [vmem:[%s227_s1] sm:$0xff]  }
   0x3   :  { %160 = vmatprep.subr.bf16.mxu0 %v177_v0  ;;  %v176_v5 = vld [vmem:[%s228_s0] sm:$0xff]  }
   0x4   :  { %v148_v14 = vld [vmem:[%s229_s2] ss:$0 sm:$0xff] }
   0x6   :  { %161 = vmatpush3.bf16.msra.mxu0 %v173_v2 }
   0x7   :  { %162 = vmatprep.subr.bf16.mxu0 %v177_v0 }
   0x8   :  { %v22_v6 = vld [vmem:[#allocation2] sm:$0xff]  ;;  %v23_v10 = vld [vmem:[#allocation2 + $0x8] sm:$0xff] }
   0xa   :  { %163 = vmatpush3.bf16.msra.mxu0 %v174_v3 }
   0xb   :  { %164 = vmatprep.subr.bf16.mxu0 %v177_v0 }
   0xe   :  { %165 = vmatpush3.bf16.msra.mxu0 %v175_v4 }
  0x11   :  { %167 = vmatmul.mubr.msk.bf16.vlgmr.msra.gmra.mxu0 %vm63_vm2, %v176_v5 }
  0xd1   :  { %v101_v7 = vpop.f32.mrf.mxu0 }
  0xd2   :  { %v108_v8 = vadd.f32 %v101_v7, %v22_v6 }
  0xd3   :  { %v168_v9 = vpop.f32.mrf.mxu0 }
  0xd4   :  { %111 = vst.msk [vmem:[#allocation2] sm:$0xff] %vm19_vm0, %v108_v8 }
  0xd5   :  { %v104_v11 = vpop.f32.mrf.mxu0 }
  0xd6   :  { %v109_v12 = vadd.f32 %v104_v11, %v23_v10 }
  0xd7   :  { %v169_v13 = vpop.f32.mrf.mxu0 }
  0xd8   :  { %112 = vst.msk [vmem:[#allocation2 + $0x8] sm:$0xff] %vm19_vm0, %v109_v12 }
  0xdb   :  { %v116_v15 = vld [vmem:[#allocation2] sm:$0xff] }
  0xdc   :  { %v125_v16 = vadd.f32 %v148_v14, %v116_v15 }
  0xde   :  { %v151_v17 = vpack.c.bf16 %v125_v16, %v125_v16 }
  0xdf   :  { %v117_v18 = vld [vmem:[#allocation2 + $0x8] sm:$0xff] }
  0xe0   :  { %136 = vst.msk [vmem:[%s230_s3] sm:$0xf] %vm135_vm3, %v151_v17  ;;  %v126_v19 = vadd.f32 %v148_v14, %v117_v18 }
  0xe2   :  { %v152_v20 = vpack.c.bf16 %v126_v19, %v126_v19 }
  0xe4   :  { %137 = vst.msk [vmem:[%s230_s3 + $0x4] sm:$0xf] %vm135_vm3, %v152_v20 }

// kernel: codebert_forward.25
= control target key start
LH: loop header
LB: loop body
LE: loop exit
PB: predicated region body
PF: predicated region fallthrough
CT: control target
= control target key end

     0   :  { %10 = vsyncpa [#allocation3], 0  ;;  %s1377_s0 = inlined_call_operand.vmem [shape: bf16[2,8,96], index: 0, kind: input, shape index: {}, may-alias: {0,1}]   ;;  %s1378_s1 = inlined_call_operand.vmem [shape: bf16[2,8,96], index: 1, kind: input, shape index: {}, may-alias: {0,1}]   ;;  %s1379_s2 = inlined_call_operand.vmem [shape: f32[2,1,8], index: 2, kind: input, shape index: {}]   ;;  %s1380_s3 = inlined_call_operand.vmem [shape: bf16[2,8,32], index: 3, kind: output, shape index: {0}]   ;;  %s1381_s4 = inlined_call_operand.hbm [shape: f32[2,1,8], index: 4, kind: output, shape index: {1}]  }
   0x1   :  { %12 = vsyncpa [#allocation3 + $0x1], 0  ;;  %s1185_s15 = smov 0   ;;  %s1187_s16 = smov 0  }
   0x2   :  { %s1189_s17 = smov 0   ;;  %s1191_s18 = smov 0  }
   0x3   :  { %s1193_s19 = smov 0   ;;  %s1195_s20 = smov 0  }
   0x4 LB: > { %s892_s21 = sadd.s32 4294967295, %s1141_s20   ;;  %s893_s22 = sadd.s32 4294967294, %s1141_s20   ;;  %s1141_s20 = sphi %s1195_s20, %s18_s20   ;;  %s1137_s19 = sphi %s1193_s19, %s1388_s19   ;;  %s1133_s18 = sphi %s1191_s18, %s1387_s18   ;;  %s1129_s17 = sphi %s1189_s17, %s1386_s17   ;;  %s1125_s16 = sphi %s1187_s16, %s1385_s16   ;;  %s1121_s15 = sphi %s1185_s15, %s1384_s15  }
   0x5   : > { %s30_s23 = sadd.s32 1, %s1137_s19  ;;  %s145_s24 = sadd.s32 1, %s1129_s17 }
   0x6   : > { %p32_p0 = scmp.ge.s32.totalorder %s30_s23, 2  ;;  %p155_p1 = scmp.ne.s32.totalorder %s1129_s17, %s1125_s16 }
   0x7   : > { %p156_p2 = scmp.eq.s32.totalorder %s892_s21, 1  ;;  %p161_p3 = scmp.ne.s32.totalorder %s1125_s16, %s1121_s15 }
   0x8   : > { %s1390_s23 = smov (%p32_p0, %s30_s23), 0  ;;  %p162_p5 = scmp.eq.s32.totalorder %s893_s22, 1 }
   0x9   : > { %p1225_p4 = por %p156_p2, %p155_p1  ;;  %s142_s26 = ssub.s32 %s1137_s19, %s1390_s23 }
   0xa   : > { %p896_p6 = scmp.ge.s32.totalorder %s1141_s20, 1  ;;  %p143_p7 = scmp.eq.s32.totalorder %s142_s26, 0 }
   0xb   : > { %p1232_p8 = por %p162_p5, %p161_p3  ;;  %p203_p9 = scmp.lt.s32.totalorder %s1141_s20, 3 }
   0xc   : > { %s1238_s28 = scalar_select %p143_p7, %s1129_s17, %s145_s24  }
   0xd   : > { %p204_p10 = pnand %p896_p6, %p203_p9 }
   0xe   : > { %p244_p11 = scmp.lt.s32.totalorder (!%p204_p10), %s1133_s18, 1  ;;  %s1145_s8 = smov (!%p204_p10), 96  }
   0xf   : > { %207 = sbr.rel (%p204_p10) target bundleno = 1558 (0x616), region = 32  ;;  %s1146_s12 = smov (!%p204_p10), 64  }
  0x10   : > { %s1147_s13 = smov (!%p204_p10), 88   ;;  %s1148_s24 = smov (!%p204_p10), 72  }
  0x11   : > { %s1149_s26 = smov (!%p204_p10), 120   ;;  %s1151_s5 = smov (!%p204_p10), 112  }
  0x12   : > { %s1152_s6 = smov (!%p204_p10), 104   ;;  %s1155_s9 = smov (!%p204_p10), 40  }
  0x13   : > { %s242_s10 = sand.u32 (!%p204_p10), 1, %s1125_s16  }
  0x14   : > { %v1143_v0 = vmov 0.0   ;;  %vm1144_vm0 = vmmov 0   ;;  %s245_s29 = scalar_select %p244_p11, %s1133_s18, 1  ;;  %vm283_vm1 = vcmask 64512   ;;  %vm347_vm2 = vcmask 1043456  }
  0x15   : > { %929 = vmatprep.subr.bf16.mxu0 %v1143_v0  ;;  %931 = vmatprep.mubr.msk.bf16.mxu0 %vm1144_vm0, %v1143_v0  ;;  %vm749_vm3 = vcmask 57344  }
  0x16   : > { %935 = vmatprep.subr.bf16.mxu1 %v1143_v0  ;;  %937 = vmatprep.mubr.msk.bf16.mxu1 %vm1144_vm0, %v1143_v0  ;;  %s1248_s30 = sshll.u32 %s245_s29, 2  ;;  %s257_s22 = scalar_lea.vmem %s1379_s2, %s245_s29 }
  0x17   : > { %s254_s7 = scalar_lea.vmem %s1378_s1, %s1248_s30  ;;  %s250_s11 = scalar_lea.vmem %s1377_s0, %s1248_s30  ;;  %v1271_v8 = vld [vmem:[%s257_s22] ss:$0 sm:$0xff] }
  0x18   : > { %v1254_v1 = vld [vmem:[%s254_s7] ss:$0 sps:$4 sm:$0xff]   ;;  %s1150_s29 = smov 80   ;;  %s1153_s7 = smov 56  }
  0x19   : > { %281 = vrot.lane.b32.xlu0 %v1254_v1, %s1145_s8  ;;  %v266_v2 = vld [vmem:[%s250_s11] sm:$0xf]  ;;  %342 = vrot.lane.b32.xlu1 %v1254_v1, %s1146_s12  ;;  %s1154_s8 = smov 48   ;;  %s243_s11 = scalar_lea.vmem [#allocation2], %s242_s10 }
  0x1a   : > { %v269_v3 = vunpack.c.l.bf16 %v266_v2  ;;  %s1156_s12 = smov 8   ;;  %s774_s14 = sshll.u32 %s243_s11, 4  ;;  %s775_s14 = int_to_ptr.vmem [resolvable:$true] %s774_s14 }
  0x1c   : > { %v270_v6 = vmul.f32 0.35355338, %v269_v3 }
  0x1d   : > { %394 = vrot.lane.b32.xlu1 %v1254_v1, %s1147_s13  ;;  %s910_s13 = sshll.u32 %s1133_s18, 4 }
  0x1e   : > { %v271_v7 = vpack.c.bf16 %v270_v6, %v270_v6 }
  0x8b   : > { %v282_v4 = vpop.permute.xlu0 %281  ;;  %v343_v15 = vpop.permute.xlu1 %342 }
  0x8c   : > { %v288_v5 = vsel %vm283_vm1, %v282_v4, 0  ;;  %v349_v16 = vsel %vm347_vm2, %v343_v15, 0 }
  0x8d   : > { %930 = vmatpush3.bf16.xpose.msra.mxu0 %v288_v5  ;;  %936 = vmatpush3.bf16.msra.mxu1 %v349_v16 }
  0x8e   : > { %947 = vmatprep.subr.bf16.mxu0 %v1143_v0  ;;  %941 = vmatprep.subr.bf16.mxu1 %v1143_v0 }
  0x8f   : > { %v395_v22 = vpop.permute.xlu1 %394 }
  0x90   : > { %v400_v28 = vsel %vm283_vm1, %v395_v22, 0 }
  0x94   : > { %932 = vmatmul.mubr.msk.bf16.vlgmr.msra.gmra.mxu0 %vm283_vm1, %v271_v7 }
  0x95   : > { %949 = vmatprep.mubr.msk.bf16.mxu0 %vm1144_vm0, %v1143_v0 }
 0x154   : > { %v324_v9 = vpop.f32.mrf.mxu0 }
 0x155   : > { %v325_v10 = vadd.f32 %v1271_v8, %v324_v9 }
 0x156   : > { %v933_v11 = vpop.f32.mrf.mxu0 }
 0x157   : > { %v330_v12 = vsel %vm283_vm1, %v325_v10, -inf }
 0x158   : > { %331 = vmax.xlane.f32.xlu0 %v330_v12  ;;  %v327_v13 = vpop.f32.mrf.mxu0 }
 0x15a   : > { %v934_v14 = vpop.f32.mrf.mxu0 }
 0x16e   : > { %616 = vrot.lane.b32.xlu0 %v1254_v1, %s1148_s24  ;;  %s1331_s24 = scalar_lea.hbm %s1381_s4, %s910_s13 }
 0x1e1   : > { %v332_v17 = vpop.xlane.xlu0 %331 }
 0x1e2   : > { %v333_v18 = vsub.f32 %v325_v10, %v332_v17 }
 0x1e4   : > { %v334_v19 = vmul.f32 1.442695, %v333_v18 }
 0x1e5   : > { %v617_v31 = vpop.permute.xlu0 %616 }
 0x1e6   : > { %1049 = vpow2.f32 %v334_v19  ;;  %v622_v33 = vsel %vm283_vm1, %v617_v31, 0 }
 0x1f3   : > { %v1050_v20 = vpop.eup %1049 }
 0x1f4   : > { %v336_v21 = vsel %vm283_vm1, %v1050_v20, 0.0 }
 0x1f5   : > { %337 = vadd.xlane.f32.xlu1 %v336_v21 }
 0x206   : > { %392 = vrot.lane.b32.xlu1 %v271_v7, %s1149_s26  ;;  %s1157_s26 = smov 16  }
 0x20a   : > { %505 = vrot.lane.b32.xlu1 %v1254_v1, %s1150_s29  ;;  %s759_s29 = scalar_lea.sflag [#allocation3], %s242_s10 }
 0x20e   : > { %503 = vrot.lane.b32.xlu1 %v271_v7, %s1151_s5  ;;  %s1065_s5 = scalar_lea.vmem %s775_s14, 16 }
 0x20f   : > { %p1066_p12 = scmp.ne.s32.totalorder %s775_s14, %s1065_s5 }
 0x211   : > { %p1067_p13 = pnand %p1066_p12, %p1225_p4 }
 0x212   : > { %614 = vrot.lane.b32.xlu1 %v271_v7, %s1152_s6  ;;  %s1158_s6 = smov [#allocation2]  }
 0x213   : > { %p1068_p0 = pneg %p1067_p13 }
 0x27e   : > { %v338_v23 = vpop.xlane.xlu1 %337 }
 0x27f   : > { %1051 = vrcp.f32 %v338_v23 }
 0x282   : > { %v393_v26 = vpop.permute.xlu1 %392 }
 0x286   : > { %v506_v29 = vpop.permute.xlu1 %505 }
 0x287   : > { %v511_v30 = vsel %vm283_vm1, %v506_v29, 0 }
 0x28a   : > { %v504_v32 = vpop.permute.xlu1 %503 }
 0x28c   : > { %v1052_v24 = vpop.eup %1051 }
 0x28d   : > { %v1280_v25 = vmul.f32 %v1052_v24, %v1050_v20 }
 0x28e   : > { %v615_v34 = vpop.permute.xlu1 %614 }
 0x28f   : > { %v341_v27 = vpack.c.bf16 %v1280_v25, %v1280_v25 }
 0x291   : > { %938 = vmatmul.mubr.msk.bf16.vlgmr.msra.gmra.mxu1 %vm283_vm1, %v341_v27 }
 0x292   : > { %942 = vmatpush3.bf16.xpose.msra.mxu1 %v400_v28  ;;  %943 = vmatprep.mubr.msk.bf16.mxu1 %vm1144_vm0, %v1143_v0 }
 0x293   : > { %953 = vmatprep.subr.bf16.mxu1 %v1143_v0 }
 0x299   : > { %944 = vmatmul.mubr.msk.bf16.vlgmr.msra.gmra.mxu1 %vm283_vm1, %v393_v26 }
 0x29a   : > { %954 = vmatpush3.bf16.xpose.msra.mxu1 %v511_v30  ;;  %955 = vmatprep.mubr.msk.bf16.mxu1 %vm1144_vm0, %v1143_v0 }
 0x29b   : > { %965 = vmatprep.subr.bf16.mxu1 %v1143_v0 }
 0x2a1   : > { %956 = vmatmul.mubr.msk.bf16.vlgmr.msra.gmra.mxu1 %vm283_vm1, %v504_v32 }
 0x2a2   : > { %966 = vmatpush3.bf16.xpose.msra.mxu1 %v622_v33  ;;  %967 = vmatprep.mubr.msk.bf16.mxu1 %vm1144_vm0, %v1143_v0 }
 0x2a9   : > { %968 = vmatmul.mubr.msk.bf16.vlgmr.msra.gmra.mxu1 %vm283_vm1, %v615_v34 }
 0x351   : > { %v1299_v35 = vpop.f32.mrf.mxu1 }
 0x353   : > { %v939_v36 = vpop.f32.mrf.mxu1 }
 0x355   : > { %v388_v37 = vpop.f32.mrf.mxu1 }
 0x357   : > { %v940_v38 = vpop.f32.mrf.mxu1 }
 0x359   : > { %v436_v39 = vpop.f32.mrf.mxu1 }
 0x35a   : > { %v437_v40 = vadd.f32 %v1271_v8, %v436_v39 }
 0x35b   : > { %v945_v41 = vpop.f32.mrf.mxu1 }
 0x35c   : > { %v442_v42 = vsel %vm283_vm1, %v437_v40, -inf }
 0x35d   : > { %443 = vmax.xlane.f32.xlu1 %v442_v42  ;;  %v439_v43 = vpop.f32.mrf.mxu1 }
 0x35f   : > { %v946_v44 = vpop.f32.mrf.mxu1 }
 0x361   : > { %v547_v45 = vpop.f32.mrf.mxu1 }
 0x362   : > { %v548_v46 = vadd.f32 %v1271_v8, %v547_v45 }
 0x363   : > { %v957_v47 = vpop.f32.mrf.mxu1 }
 0x364   : > { %v553_v48 = vsel %vm283_vm1, %v548_v46, -inf }
 0x365   : > { %554 = vmax.xlane.f32.xlu0 %v553_v48  ;;  %v550_v49 = vpop.f32.mrf.mxu1 }
 0x367   : > { %v958_v50 = vpop.f32.mrf.mxu1 }
 0x369   : > { %v658_v51 = vpop.f32.mrf.mxu1 }
 0x36a   : > { %v659_v52 = vadd.f32 %v1271_v8, %v658_v51 }
 0x36b   : > { %v969_v53 = vpop.f32.mrf.mxu1 }
 0x36c   : > { %v664_v54 = vsel %vm283_vm1, %v659_v52, -inf }
 0x36d   : > { %665 = vmax.xlane.f32.xlu1 %v664_v54  ;;  %v661_v55 = vpop.f32.mrf.mxu1 }
 0x36f   : > { %v970_v56 = vpop.f32.mrf.mxu1 }
 0x3e6   : > { %v444_v57 = vpop.xlane.xlu1 %443 }
 0x3e7   : > { %v445_v58 = vsub.f32 %v437_v40, %v444_v57 }
 0x3e9   : > { %v446_v59 = vmul.f32 1.442695, %v445_v58 }
 0x3eb   : > { %1053 = vpow2.f32 %v446_v59 }
 0x3ee   : > { %v555_v5 = vpop.xlane.xlu0 %554 }
 0x3ef   : > { %v556_v6 = vsub.f32 %v548_v46, %v555_v5 }
 0x3f1   : > { %v557_v7 = vmul.f32 1.442695, %v556_v6 }
 0x3f6   : > { %v666_v60 = vpop.xlane.xlu1 %665 }
 0x3f7   : > { %v667_v61 = vsub.f32 %v659_v52, %v666_v60 }
 0x3f8   : > { %v1054_v62 = vpop.eup %1053 }
 0x3f9   : > { %v668_v63 = vmul.f32 1.442695, %v667_v61  ;;  %v448_v2 = vsel %vm283_vm1, %v1054_v62, 0.0 }
 0x3fa   : > { %449 = vadd.xlane.f32.xlu1 %v448_v2 }
 0x3fb   : > { %1055 = vpow2.f32 %v668_v63 }
 0x3fc   : > { %1057 = vpow2.f32 %v557_v7 }
 0x408   : > { %v1056_v3 = vpop.eup %1055 }
 0x409   : > { %v670_v4 = vsel %vm283_vm1, %v1056_v3, 0.0  ;;  %v1058_v8 = vpop.eup %1057 }
 0x40a   : > { %671 = vadd.xlane.f32.xlu0 %v670_v4  ;;  %v559_v9 = vsel %vm283_vm1, %v1058_v8, 0.0 }
 0x40b   : > { %454 = vrot.lane.b32.xlu1 %v1254_v1, %s1153_s7  ;;  %s1069_s7 = sshll.u32 %s1158_s6, 4  ;;  %s1070_s7 = int_to_ptr.vmem [resolvable:$false] %s1069_s7 }
 0x40c   : > { %s1071_s18 = scalar_lea.vmem %s1070_s7, 32  ;;  %p1072_p1 = scmp.lt.s32.totalorder %s775_s14, %s1070_s7 }
 0x40d   : > { %p1073_p2 = scmp.lt.s32.totalorder %s1071_s18, %s1065_s5 }
 0x40f   : > { %p1074_p3 = por %p1073_p2, %p1072_p1 }
 0x411   : > { %p1075_p5 = pnand %p1074_p3, %p1068_p0 }
 0x420   : > { %565 = vrot.lane.b32.xlu0 %v1254_v1, %s1154_s8 }
 0x42f   : > { %560 = vadd.xlane.f32.xlu1 %v559_v9 }
 0x440   : > { %676 = vrot.lane.b32.xlu1 %v1254_v1, %s1155_s9 }
 0x483   : > { %v450_v10 = vpop.xlane.xlu1 %449 }
 0x484   : > { %1059 = vrcp.f32 %v450_v10 }
 0x487   : > { %v455_v11 = vpop.permute.xlu1 %454 }
 0x488   : > { %v460_v12 = vsel %vm347_vm2, %v455_v11, 0 }
 0x489   : > { %948 = vmatpush3.bf16.msra.mxu0 %v460_v12 }
 0x48a   : > { %959 = vmatprep.subr.bf16.mxu0 %v1143_v0 }
 0x491   : > { %v1060_v13 = vpop.eup %1059 }
 0x492   : > { %v452_v14 = vmul.f32 %v1060_v13, %v1054_v62 }
 0x493   : > { %v672_v15 = vpop.xlane.xlu0 %671 }
 0x494   : > { %v453_v16 = vpack.c.bf16 %v452_v14, %v452_v14  ;;  %1061 = vrcp.f32 %v672_v15  ;;  %v502_v23 = vadd.f32 %v452_v14, %v1280_v25 }
 0x496   : > { %950 = vmatmul.mubr.msk.bf16.vlgmr.msra.gmra.mxu0 %vm283_vm1, %v453_v16 }
 0x497   : > { %v566_v17 = vpop.permute.xlu0 %565  ;;  %961 = vmatprep.mubr.msk.bf16.mxu0 %vm1144_vm0, %v1143_v0 }
 0x498   : > { %v571_v1 = vsel %vm347_vm2, %v566_v17, 0 }
 0x499   : > { %960 = vmatpush3.bf16.msra.mxu0 %v571_v1 }
 0x49a   : > { %971 = vmatprep.subr.bf16.mxu0 %v1143_v0 }
 0x4a1   : > { %v1062_v19 = vpop.eup %1061 }
 0x4a2   : > { %v674_v27 = vmul.f32 %v1062_v19, %v1056_v3 }
 0x4a4   : > { %v675_v30 = vpack.c.bf16 %v674_v27, %v674_v27 }
 0x4b8   : > { %v561_v18 = vpop.xlane.xlu1 %560 }
 0x4b9   : > { %1063 = vrcp.f32 %v561_v18 }
 0x4bc   : > { %v677_v21 = vpop.permute.xlu1 %676 }
 0x4bd   : > { %v682_v24 = vsel %vm347_vm2, %v677_v21, 0 }
 0x4c6   : > { %v1064_v20 = vpop.eup %1063 }
 0x4c7   : > { %v563_v22 = vmul.f32 %v1064_v20, %v1058_v8 }
 0x4c9   : > { %v564_v26 = vpack.c.bf16 %v563_v22, %v563_v22  ;;  %v613_v28 = vadd.f32 %v563_v22, %v502_v23 }
 0x4cb   : > { %962 = vmatmul.mubr.msk.bf16.vlgmr.msra.gmra.mxu0 %vm283_vm1, %v564_v26  ;;  %v724_v29 = vadd.f32 %v674_v27, %v613_v28 }
 0x4cc   : > { %972 = vmatpush3.bf16.msra.mxu0 %v682_v24  ;;  %973 = vmatprep.mubr.msk.bf16.mxu0 %vm1144_vm0, %v1143_v0 }
 0x4cd   : > { %750 = vst.msk [vmem:[%s243_s11] sm:$0x1] %vm749_vm3, %v724_v29 }
 0x4d3   : > { %974 = vmatmul.mubr.msk.bf16.vlgmr.msra.gmra.mxu0 %vm283_vm1, %v675_v30 }
 0x556   : > { %v496_v25 = vpop.f32.mrf.mxu0 }
 0x557   : > { %726 = vrot.lane.b32.xlu1 %v496_v25, %s1156_s12 }
 0x558   : > { %v951_v31 = vpop.f32.mrf.mxu0 }
 0x55a   : > { %v499_v32 = vpop.f32.mrf.mxu0 }
 0x55c   : > { %v952_v33 = vpop.f32.mrf.mxu0 }
 0x58b   : > { %v607_v0 = vpop.f32.mrf.mxu0 }
 0x58c   : > { %730 = vrot.lane.b32.xlu0 %v607_v0, %s1157_s26 }
 0x58d   : > { %1078 = shalt.err (!%p1075_p5)
}
 0x58e   : > { %s1079_s8 = scalar_lea.hbm %s1331_s24, 16  ;;  %s1083_s11 = scalar_lea.hbm %s1381_s4, 32 }
 0x58f   : > { %p1080_p6 = scmp.ne.s32.totalorder %s1331_s24, %s1079_s8  ;;  %p1084_p10 = scmp.lt.s32.totalorder %s1331_s24, %s1381_s4 }
 0x590   : > { %p1085_p11 = scmp.lt.s32.totalorder %s1083_s11, %s1079_s8 }
 0x591   : > { %p1081_p7 = pnand %p1080_p6, %p1225_p4 }
 0x592   : > { %p1086_p12 = por %p1085_p11, %p1084_p10 }
 0x593   : > { %p1082_p9 = pneg %p1081_p7 }
 0x595   : > { %p1087_p13 = pnand %p1086_p12, %p1082_p9 }
 0x597   : > { %1090 = shalt.err (!%p1087_p13)
}
 0x598   : > { %977 = dma.vmem_to_hbm [thread:$0]  (%p1225_p4), %s775_s14, 16, %s1331_s24, %s759_s29   ;;  %v963_v34 = vpop.f32.mrf.mxu0  ;;  %vm738_vm4 = vcmask 130048   ;;  %vm740_vm5 = vcmask 195584   ;;  %vm743_vm6 = vcmask 257024  }
 0x599   : > { %s1159_s21 = smov 24   ;;  %s264_s22 = scalar_lea.vmem %s1380_s3, %s1248_s30 }
 0x59a   : > { %v610_v36 = vpop.f32.mrf.mxu0 }
 0x59c   : > { %v964_v37 = vpop.f32.mrf.mxu0 }
 0x59e   : > { %v718_v38 = vpop.f32.mrf.mxu0 }
 0x59f   : > { %734 = vrot.lane.b32.xlu1 %v718_v38, %s1159_s21 }
 0x5a0   : > { %v975_v39 = vpop.f32.mrf.mxu0 }
 0x5a2   : > { %v721_v40 = vpop.f32.mrf.mxu0 }
 0x5a4   : > { %v976_v41 = vpop.f32.mrf.mxu0 }
 0x5c9   : > { %v727_v42 = vpop.permute.xlu1 %726 }
 0x5ca   : > { %v737_v44 = vsel %vm283_vm1, %v1299_v35, %v727_v42 }
 0x5fe   : > { %v731_v43 = vpop.permute.xlu0 %730 }
 0x5ff   : > { %v739_v45 = vsel %vm738_vm4, %v737_v44, %v731_v43 }
 0x611   : > { %v735_v46 = vpop.permute.xlu1 %734 }
 0x612   : > { %v741_v47 = vsel %vm740_vm5, %v739_v45, %v735_v46 }
 0x613   : > { %v742_v48 = vpack.c.bf16 %v741_v47, %v741_v47 }
 0x615   : > { %744 = vst.msk [vmem:[%s264_s22] sm:$0xf] %vm743_vm6, %v742_v48 }
 0x616 PF: > { %p983_p4 = scmp.ge.s32.totalorder %s1141_s20, 2  ;;  %s796_s24 = sand.u32 1, %s1121_s15  }
 0x617   : > { %s797_s26 = scalar_lea.sflag [#allocation3], %s796_s24 }
 0x618   : > { %p980_p0 = pnand %p983_p4, %p1232_p8 }
 0x61a   : > { %p981_p1 = pneg %p980_p0 }
 0x61c   : > { %1116 = dma.done.wait (%p981_p1), %s797_s26, 16  }
 0x61d   : > { %1118 = vsyncadd (%p981_p1), %s797_s26, 4294967280  ;;  %s18_s20 = sadd.s32 1, %s1141_s20   ;;  %s1384_s15 = smov %s1125_s16 }
 0x61e   : > { %p15_p2 = scmp.ge.s32.totalorder %s18_s20, 4   ;;  %s1385_s16 = smov %s1129_s17 }
 0x61f   : > { %s1386_s17 = smov %s1238_s28  ;;  %s1387_s18 = smov %s1137_s19 }
 0x620   : > { %s1388_s19 = smov %s1390_s23  ;;  %17 = sbr.rel (!%p15_p2) target bundleno = 4 (0x4), region = 89 }
 0x625   :  { %801 = vsyncpa [#allocation3], 1 }
 0x626   :  { %803 = vsyncpa [#allocation3 + $0x1], 1 }

// kernel: codebert_forward.31
= control target key start
LH: loop header
LB: loop body
LE: loop exit
PB: predicated region body
PF: predicated region fallthrough
CT: control target
= control target key end

     0   :  { %v204_v0 = vmov 0.0   ;;  %vm205_vm0 = vmmov 0   ;;  %vm47_vm1 = vcmask 261120   ;;  %vm160_vm2 = vcmask 1024   ;;  %s262_s1 = inlined_call_operand.vmem [shape: bf16[32,32], index: 1, kind: input, shape index: {}]   ;;  %s263_s0 = inlined_call_operand.vmem [shape: bf16[2,32], index: 0, kind: input, shape index: {}]   ;;  %s264_s3 = inlined_call_operand.vmem [shape: bf16[32,1], index: 3, kind: input, shape index: {}]   ;;  %s265_s4 = inlined_call_operand.<no memory space> [shape: f32[1,1], index: 4, kind: input, shape index: {}]   ;;  %s266_s2 = inlined_call_operand.vmem [shape: f32[1,32], index: 2, kind: input, shape index: {}]   ;;  %s267_s5 = inlined_call_operand.vmem [shape: f32[2,1], index: 5, kind: output, shape index: {}]  }
   0x1   :  { %180 = vmatprep.subr.bf16.mxu0 %v204_v0  ;;  %v198_v1 = vld [vmem:[%s262_s1 + $0x8] sm:$0xff]   ;;  %184 = vmatprep.mubr.msk.bf16.mxu0 %vm205_vm0, %v204_v0  ;;  %v199_v2 = vld [vmem:[%s262_s1] sm:$0xff]   ;;  %v10_v6 = vstv %s265_s4 }
   0x2   :  { %188 = vmatprep.subr.bf16.mxu1 %v204_v0  ;;  %192 = vmatprep.mubr.msk.bf16.mxu1 %vm205_vm0, %v204_v0  ;;  %v23_v3 = vld [vmem:[%s263_s0] sm:$0x1]  ;;  %v200_v4 = vld [vmem:[%s264_s3 + $0x8] sm:$0xff]   ;;  %11 = vst [vmem:[#allocation2] sm:$0x1] %v10_v6 }
   0x3   :  { %181 = vmatpush3.bf16.msra.mxu0 %v198_v1  ;;  %189 = vmatpush3.bf16.msra.mxu1 %v200_v4  ;;  %v201_v5 = vld [vmem:[%s264_s3] sm:$0xff]  }
   0x4   :  { %182 = vmatprep.subr.bf16.mxu0 %v204_v0  ;;  %190 = vmatprep.subr.bf16.mxu1 %v204_v0  ;;  %v166_v7 = vld [vmem:[%s266_s2] ss:$0 sm:$0xff] }
   0x7   :  { %183 = vmatpush3.bf16.msra.mxu0 %v199_v2  ;;  %191 = vmatpush3.bf16.msra.mxu1 %v201_v5 }
   0x9   :  { %v170_v16 = vld [vmem:[#allocation2] ss:$0 sm:$0xff] }
   0xa   :  { %185 = vmatmul.mubr.msk.bf16.vlgmr.msra.gmra.mxu0 %vm47_vm1, %v23_v3 }
  0xca   :  { %v85_v8 = vpop.f32.mrf.mxu0 }
  0xcb   :  { %v86_v9 = vadd.f32 %v166_v7, %v85_v8 }
  0xcc   :  { %v186_v10 = vpop.f32.mrf.mxu0 }
  0xcd   :  { %202 = vtanh.f32 %v86_v9 }
  0xce   :  { %v88_v11 = vpop.f32.mrf.mxu0 }
  0xd0   :  { %v187_v12 = vpop.f32.mrf.mxu0 }
  0xda   :  { %v203_v13 = vpop.eup %202 }
  0xdb   :  { %v92_v14 = vmax.f32 %v203_v13, 0.0 }
  0xdd   :  { %v93_v15 = vpack.c.bf16 %v92_v14, %v92_v14 }
  0xdf   :  { %193 = vmatmul.mubr.msk.bf16.vlgmr.msra.gmra.mxu1 %vm47_vm1, %v93_v15 }
 0x19f   :  { %v154_v17 = vpop.f32.mrf.mxu1 }
 0x1a0   :  { %v155_v18 = vadd.f32 %v170_v16, %v154_v17 }
 0x1a1   :  { %v194_v19 = vpop.f32.mrf.mxu1 }
 0x1a2   :  { %161 = vst.msk [vmem:[%s267_s5] sm:$0x3] %vm160_vm2, %v155_v18 }
 0x1a3   :  { %v157_v20 = vpop.f32.mrf.mxu1 }
 0x1a5   :  { %v195_v21 = vpop.f32.mrf.mxu1 }

</bundles_post_ra>
